<compile_context>
chip_gen: v5e
topology: v5e:2x2
jax: 0.10.0
libtpu: 0.0.40
codegen_flags: <defaults>
</compile_context>

<pallas_src>
import jax
import jax.numpy as jnp
import numpy as np
from jax import lax
from jax.experimental import pallas as pl
from jax.experimental.pallas import tpu as pltpu

# ------------------ scaled-down hyper-parameters (original in comments) -------
B          = 2    # batch (= LSTM time axis due to the PyTorch quirk)
CIN        = 3    # image channels
IMG_HW     = 16   # spatial size
COUT       = 8    # conv channels of the backbone stand-in
ENC_DIM    = 64   # analog of resnet50's 1000-dim output
NUM_FEAT   = 4    # analog of num_features (= 9)
MAX_LEN    = 24   # LSTM input size (= 24*6 = 144)
EMB_DIM    = 32   # LSTM hidden size (= embedding_dim = 512)
RNN_FC_DIM = 64   # analog of rnn_fc's 1000-dim output
CLASS_N    = 10   # number of classes

HPAD    = 128                 # per-gate hidden width padded to one full vreg lane width
KPAD    = 32                  # im2col contraction dim 27 -> 32
OUT_PAD = 128                 # lane-dense logits store width
HW      = IMG_HW * IMG_HW


# =============================== fused Pallas kernel ===========================
def cnn2rnn_kernel(patch_ref, pool_ref, wconv_ref, bconv_ref, wfc_ref, bfc_ref,
                   seq_ref, wih_ref, whh_ref, blstm_ref,
                   wr3_ref, brnn_ref, wfe_ref, wfh_ref, bfin_ref, out_ref):
    f32 = jnp.float32

    # ---- CNN encoder stand-in: conv3x3 (im2col matmul) -> ReLU -> GAP -> FC -------
    conv = jnp.dot(patch_ref[...], wconv_ref[...], preferred_element_type=f32)
    conv = jnp.maximum(conv + bconv_ref[...], 0.0)                       # (B*HW, COUT)
    pooled = jnp.dot(pool_ref[...], conv, preferred_element_type=f32)    # (B, COUT) GAP as matmul
    enc = jnp.dot(pooled, wfc_ref[...],
                  preferred_element_type=f32) + bfc_ref[...]             # (B, ENC_DIM)

    # ---- LSTM: input projection hoisted out of the recurrence ---------------------
    # gates_x[t*N + n, :] = seq[t, n, :] @ W_ih^T + (b_ih + b_hh), in the gate-padded
    # layout (each gate occupies a 128-wide lane block, real values in lanes [:EMB_DIM]).
    gates_x = (jnp.dot(seq_ref[...], wih_ref[...], preferred_element_type=f32)
               + blstm_ref[...])                                         # (T*N, 4*HPAD)
    whh = whh_ref[...]                                                   # (HPAD, 4*HPAD)

    h = jnp.zeros((NUM_FEAT, HPAD), f32)
    c = jnp.zeros((NUM_FEAT, HPAD), f32)
    rnn_rows = []
    for t in range(B):                   # fully unrolled serial recurrence (T == B)
        gates = (gates_x[t * NUM_FEAT:(t + 1) * NUM_FEAT, :]
                 + jnp.dot(h, whh, preferred_element_type=f32))          # (N, 4*HPAD)
        # 128-aligned, 128-wide gate slices (PyTorch order i, f, g, o)
        i = jax.nn.sigmoid(gates[:, 0 * HPAD:1 * HPAD])
        f = jax.nn.sigmoid(gates[:, 1 * HPAD:2 * HPAD])
        g = jnp.tanh(gates[:, 2 * HPAD:3 * HPAD])
        o = jax.nn.sigmoid(gates[:, 3 * HPAD:4 * HPAD])
        c = f * c + i * g                 # padded lanes stay exactly 0
        h = o * jnp.tanh(c)
        # rnn_fc for this timestep: hidden.view(t, -1) @ W_rnn == sum over feature rows
        row = brnn_ref[...]                                              # (1, RNN_FC_DIM)
        for n in range(NUM_FEAT):
            row = row + jnp.dot(h[n:n + 1, :], wr3_ref[n],
                                preferred_element_type=f32)
        rnn_rows.append(row)
    rnn_out = jnp.concatenate(rnn_rows, axis=0)                          # (B, RNN_FC_DIM)

    # ---- head: concat([enc, hidden]) @ W_final as split-weight matmuls, lane-padded
    logits = (jnp.dot(enc, wfe_ref[...], preferred_element_type=f32)
              + jnp.dot(rnn_out, wfh_ref[...], preferred_element_type=f32)
              + bfin_ref[...])                                           # (B, OUT_PAD)
    out_ref[...] = logits


# =============================== wrappers =====================================
def im2col(img):
    """(B, Cin, H, W) -> (B, H*W, Cin*9) for a 3x3 / stride 1 / pad 1 conv."""
    bsz, cin, h, w = img.shape
    pad = jnp.pad(img, ((0, 0), (0, 0), (1, 1), (1, 1)))
    cols = []
    for kh in range(3):
        for kw in range(3):
            cols.append(pad[:, :, kh:kh + h, kw:kw + w])
    patches = jnp.stack(cols, axis=2)                   # (B, Cin, 9, H, W)
    patches = patches.reshape(bsz, cin * 9, h * w)
    return patches.transpose(0, 2, 1)                   # (B, H*W, Cin*9)


def fused_forward(patches_pad, seq2d, kp):
    vmem = pl.BlockSpec(memory_space=pltpu.MemorySpace.VMEM)
    out = pl.pallas_call(
        cnn2rnn_kernel,
        out_shape=jax.ShapeDtypeStruct((B, OUT_PAD), jnp.float32),
        in_specs=[vmem] * 15,
        out_specs=vmem,
    )(patches_pad, kp["pool"], kp["wconv"], kp["bconv"], kp["wfc"], kp["bfc"],
      seq2d, kp["wih"], kp["whh"], kp["blstm"],
      kp["wr3"], kp["brnn"], kp["wfe"], kp["wfh"], kp["bfin"])
    return out[:, :CLASS_N]                             # drop lane padding


@jax.jit
def cnn2rnn_forward(img, seq, kparams):
    patches = im2col(img)                               # glue (XLA)
    p2d = patches.reshape(B * HW, CIN * 9)
    p2d = jnp.pad(p2d, ((0, 0), (0, KPAD - CIN * 9)))   # K = 27 -> 32 zero pad
    seq2d = seq.reshape(B * NUM_FEAT, MAX_LEN)          # row t*N + n == seq[t, n]
    return fused_forward(p2d, seq2d, kparams)


# =============================== parameters ===================================
def init_params(key):
    ks = jax.random.split(key, 12)

    def norm(k, shape, scale=0.1):
        return (scale * jax.random.normal(k, shape)).astype(jnp.float32)

    wconv = norm(ks[0], (COUT, CIN, 3, 3))            # backbone stand-in conv
    bconv = norm(ks[1], (COUT,))
    wfc = norm(ks[2], (ENC_DIM, COUT))                # backbone stand-in fc
    bfc = norm(ks[3], (ENC_DIM,))
    w_ih = norm(ks[4], (4 * EMB_DIM, MAX_LEN))        # nn.LSTM weight_ih_l0 (i,f,g,o)
    w_hh = norm(ks[5], (4 * EMB_DIM, EMB_DIM))        # nn.LSTM weight_hh_l0
    b_ih = norm(ks[6], (4 * EMB_DIM,))
    b_hh = norm(ks[7], (4 * EMB_DIM,))
    w_rnn = norm(ks[8], (RNN_FC_DIM, NUM_FEAT * EMB_DIM))   # rnn_fc
    b_rnn = norm(ks[9], (RNN_FC_DIM,))
    w_fin = norm(ks[10], (CLASS_N, ENC_DIM + RNN_FC_DIM))   # final_layer
    b_fin = norm(ks[11], (CLASS_N,))

    return dict(
        wconv_mat=wconv.reshape(COUT, CIN * 9).T,     # (Cin*9, Cout)
        bconv=bconv[None, :],                         # (1, Cout)
        wfc_mat=wfc.T,                                # (Cout, ENC_DIM)
        bfc=bfc[None, :],
        w_ih=w_ih, w_hh=w_hh, b_ih=b_ih, b_hh=b_hh,
        w_rnn=w_rnn.T,                                # (N*H, RNN_FC_DIM)
        b_rnn=b_rnn[None, :],
        wfe=w_fin[:, :ENC_DIM].T,                     # (ENC_DIM, CLASS_N)
        wfh=w_fin[:, ENC_DIM:].T,                     # (RNN_FC_DIM, CLASS_N)
        bf=b_fin[None, :],
    )


def prepare_kernel_params(p):
    """Build the padded / lane-aligned operand set consumed by the fused kernel."""
    f32 = np.float32
    Hd, R = EMB_DIM, RNN_FC_DIM

    wih_t = np.asarray(p["w_ih"]).T                   # (In, 4*Hd) gate order i,f,g,o
    whh_t = np.asarray(p["w_hh"]).T                   # (Hd, 4*Hd)
    bias = np.asarray(p["b_ih"]) + np.asarray(p["b_hh"])

    wih = np.zeros((MAX_LEN, 4 * HPAD), f32)          # gate blocks at 128-lane offsets
    whh = np.zeros((HPAD, 4 * HPAD), f32)             # rows >= Hd are zero
    bl = np.zeros((1, 4 * HPAD), f32)
    for g in range(4):
        wih[:, g * HPAD:g * HPAD + Hd] = wih_t[:, g * Hd:(g + 1) * Hd]
        whh[:Hd, g * HPAD:g * HPAD + Hd] = whh_t[:, g * Hd:(g + 1) * Hd]
        bl[0, g * HPAD:g * HPAD + Hd] = bias[g * Hd:(g + 1) * Hd]

    w_rnn = np.asarray(p["w_rnn"])                    # (N*Hd, R)
    wr3 = np.zeros((NUM_FEAT, HPAD, R), f32)          # per-feature block, rows >= Hd zero
    for n in range(NUM_FEAT):
        wr3[n, :Hd, :] = w_rnn[n * Hd:(n + 1) * Hd, :]

    wfe = np.zeros((ENC_DIM, OUT_PAD), f32)
    wfe[:, :CLASS_N] = np.asarray(p["wfe"])
    wfh = np.zeros((R, OUT_PAD), f32)
    wfh[:, :CLASS_N] = np.asarray(p["wfh"])
    bfin = np.zeros((1, OUT_PAD), f32)
    bfin[0, :CLASS_N] = np.asarray(p["bf"])[0]

    wconv = np.zeros((KPAD, COUT), f32)               # K = 27 -> 32 zero pad
    wconv[:CIN * 9, :] = np.asarray(p["wconv_mat"])

    pool = np.zeros((B, B * HW), f32)                 # global-avg-pool as a matmul
    for b in range(B):
        pool[b, b * HW:(b + 1) * HW] = 1.0 / HW

    j = lambda a: jnp.asarray(a, jnp.float32)
    return dict(pool=j(pool), wconv=j(wconv), bconv=p["bconv"], wfc=p["wfc_mat"],
                bfc=p["bfc"], wih=j(wih), whh=j(whh), blstm=j(bl),
                wr3=j(wr3), brnn=p["b_rnn"], wfe=j(wfe), wfh=j(wfh), bfin=j(bfin))


# ============================ pure-JAX reference ==============================
def reference_forward(img, seq, params):
    patches = im2col(img)
    conv = jnp.maximum(
        jnp.einsum("bpk,kc->bpc", patches, params["wconv_mat"]) + params["bconv"], 0.0)
    pooled = conv.mean(axis=1)
    enc = pooled @ params["wfc_mat"] + params["bfc"]

    wih_t, whh_t = params["w_ih"].T, params["w_hh"].T
    bias = params["b_ih"] + params["b_hh"]

    def step(carry, x_t):
        h, c = carry
        gates = x_t @ wih_t + h @ whh_t + bias
        i, f, g, o = jnp.split(gates, 4, axis=-1)
        c = jax.nn.sigmoid(f) * c + jax.nn.sigmoid(i) * jnp.tanh(g)
        h = jax.nn.sigmoid(o) * jnp.tanh(c)
        return (h, c), h

    h0 = jnp.zeros((NUM_FEAT, EMB_DIM), jnp.float32)
    _, hs = lax.scan(step, (h0, h0), seq)
    hid = hs.reshape(seq.shape[0], -1)
    hidden = hid @ params["w_rnn"] + params["b_rnn"]
    return enc @ params["wfe"] + hidden @ params["wfh"] + params["bf"]


# ==================================== main ====================================
if __name__ == "__main__":
    key = jax.random.PRNGKey(0)
    kp_, ki, ks = jax.random.split(key, 3)
    base = init_params(kp_)
    kparams = prepare_kernel_params(base)
    img = jax.random.normal(ki, (B, CIN, IMG_HW, IMG_HW), jnp.float32)
    seq = jax.random.normal(ks, (B, NUM_FEAT, MAX_LEN), jnp.float32)

    out = cnn2rnn_forward(img, seq, kparams)
    out = jax.block_until_ready(out)
    assert out.shape == (B, CLASS_N)

    ref = reference_forward(img, seq, base)
    np.testing.assert_allclose(np.asarray(out), np.asarray(ref), rtol=2e-2, atol=2e-2)
    print("KERNEL_OK")
</pallas_src>

<mosaic_0001>
module attributes {stable_mosaic.version = 11 : i64} {
  func.func @cnn2rnn_kernel(%arg0: memref<512x32xf32, #tpu.memory_space<vmem>>, %arg1: memref<2x512xf32, #tpu.memory_space<vmem>>, %arg2: memref<32x8xf32, #tpu.memory_space<vmem>>, %arg3: memref<1x8xf32, #tpu.memory_space<vmem>>, %arg4: memref<8x64xf32, #tpu.memory_space<vmem>>, %arg5: memref<1x64xf32, #tpu.memory_space<vmem>>, %arg6: memref<8x24xf32, #tpu.memory_space<vmem>>, %arg7: memref<24x512xf32, #tpu.memory_space<vmem>>, %arg8: memref<128x512xf32, #tpu.memory_space<vmem>>, %arg9: memref<1x512xf32, #tpu.memory_space<vmem>>, %arg10: memref<4x128x64xf32, #tpu.memory_space<vmem>>, %arg11: memref<1x64xf32, #tpu.memory_space<vmem>>, %arg12: memref<64x128xf32, #tpu.memory_space<vmem>>, %arg13: memref<64x128xf32, #tpu.memory_space<vmem>>, %arg14: memref<1x128xf32, #tpu.memory_space<vmem>>, %arg15: memref<2x128xf32, #tpu.memory_space<vmem>>) attributes {dimension_semantics = [], scalar_prefetch = 0 : i64, scratch_operands = 0 : i64, tpu.core_type = #tpu.core_type<tc>} {
    %c0 = arith.constant 0 : index
    %c0_0 = arith.constant 0 : index
    %0 = vector.load %arg0[%c0, %c0_0] : memref<512x32xf32, #tpu.memory_space<vmem>>, vector<512x32xf32>
    %c0_1 = arith.constant 0 : index
    %c0_2 = arith.constant 0 : index
    %1 = vector.load %arg2[%c0_1, %c0_2] : memref<32x8xf32, #tpu.memory_space<vmem>>, vector<32x8xf32>
    %cst = arith.constant dense<0.000000e+00> : vector<512x8xf32>
    %2 = tpu.matmul %0, %1, %cst {dimension_numbers = #tpu.dot_dimension_numbers<[1], [0], [0], [1], [0, 0, 1, 1], [], []>} : vector<512x32xf32>, vector<32x8xf32>, vector<512x8xf32> -> vector<512x8xf32>
    %c0_3 = arith.constant 0 : index
    %c0_4 = arith.constant 0 : index
    %3 = vector.load %arg3[%c0_3, %c0_4] : memref<1x8xf32, #tpu.memory_space<vmem>>, vector<1x8xf32>
    %4 = vector.broadcast %3 : vector<1x8xf32> to vector<512x8xf32>
    %5 = arith.addf %2, %4 : vector<512x8xf32>
    %cst_5 = arith.constant 0.000000e+00 : f32
    %6 = vector.broadcast %cst_5 : f32 to vector<512x8xf32>
    %7 = arith.maximumf %5, %6 : vector<512x8xf32>
    %c0_6 = arith.constant 0 : index
    %c0_7 = arith.constant 0 : index
    %8 = vector.load %arg1[%c0_6, %c0_7] : memref<2x512xf32, #tpu.memory_space<vmem>>, vector<2x512xf32>
    %cst_8 = arith.constant dense<0.000000e+00> : vector<2x8xf32>
    %9 = tpu.matmul %8, %7, %cst_8 {dimension_numbers = #tpu.dot_dimension_numbers<[1], [0], [0], [1], [0, 0, 1, 1], [], []>} : vector<2x512xf32>, vector<512x8xf32>, vector<2x8xf32> -> vector<2x8xf32>
    %c0_9 = arith.constant 0 : index
    %c0_10 = arith.constant 0 : index
    %10 = vector.load %arg4[%c0_9, %c0_10] : memref<8x64xf32, #tpu.memory_space<vmem>>, vector<8x64xf32>
    %cst_11 = arith.constant dense<0.000000e+00> : vector<2x64xf32>
    %11 = tpu.matmul %9, %10, %cst_11 {dimension_numbers = #tpu.dot_dimension_numbers<[1], [0], [0], [1], [0, 0, 1, 1], [], []>} : vector<2x8xf32>, vector<8x64xf32>, vector<2x64xf32> -> vector<2x64xf32>
    %c0_12 = arith.constant 0 : index
    %c0_13 = arith.constant 0 : index
    %12 = vector.load %arg5[%c0_12, %c0_13] : memref<1x64xf32, #tpu.memory_space<vmem>>, vector<1x64xf32>
    %13 = vector.broadcast %12 : vector<1x64xf32> to vector<2x64xf32>
    %14 = arith.addf %11, %13 : vector<2x64xf32>
    %c0_14 = arith.constant 0 : index
    %c0_15 = arith.constant 0 : index
    %15 = vector.load %arg6[%c0_14, %c0_15] : memref<8x24xf32, #tpu.memory_space<vmem>>, vector<8x24xf32>
    %c0_16 = arith.constant 0 : index
    %c0_17 = arith.constant 0 : index
    %16 = vector.load %arg7[%c0_16, %c0_17] : memref<24x512xf32, #tpu.memory_space<vmem>>, vector<24x512xf32>
    %cst_18 = arith.constant dense<0.000000e+00> : vector<8x512xf32>
    %17 = tpu.matmul %15, %16, %cst_18 {dimension_numbers = #tpu.dot_dimension_numbers<[1], [0], [0], [1], [0, 0, 1, 1], [], []>} : vector<8x24xf32>, vector<24x512xf32>, vector<8x512xf32> -> vector<8x512xf32>
    %c0_19 = arith.constant 0 : index
    %c0_20 = arith.constant 0 : index
    %18 = vector.load %arg9[%c0_19, %c0_20] : memref<1x512xf32, #tpu.memory_space<vmem>>, vector<1x512xf32>
    %19 = vector.broadcast %18 : vector<1x512xf32> to vector<8x512xf32>
    %20 = arith.addf %17, %19 : vector<8x512xf32>
    %c0_21 = arith.constant 0 : index
    %c0_22 = arith.constant 0 : index
    %21 = vector.load %arg8[%c0_21, %c0_22] : memref<128x512xf32, #tpu.memory_space<vmem>>, vector<128x512xf32>
    %cst_23 = arith.constant 0.000000e+00 : f32
    %22 = vector.broadcast %cst_23 : f32 to vector<4x128xf32>
    %cst_24 = arith.constant 0.000000e+00 : f32
    %23 = vector.broadcast %cst_24 : f32 to vector<4x128xf32>
    %24 = vector.extract_strided_slice %20 {offsets = [0, 0], sizes = [4, 512], strides = [1, 1]} : vector<8x512xf32> to vector<4x512xf32>
    %cst_25 = arith.constant dense<0.000000e+00> : vector<4x512xf32>
    %25 = tpu.matmul %22, %21, %cst_25 {dimension_numbers = #tpu.dot_dimension_numbers<[1], [0], [0], [1], [0, 0, 1, 1], [], []>} : vector<4x128xf32>, vector<128x512xf32>, vector<4x512xf32> -> vector<4x512xf32>
    %26 = arith.addf %24, %25 : vector<4x512xf32>
    %27 = vector.extract_strided_slice %26 {offsets = [0, 0], sizes = [4, 128], strides = [1, 1]} : vector<4x512xf32> to vector<4x128xf32>
    %28 = arith.negf %27 : vector<4x128xf32>
    %29 = math.exp %28 : vector<4x128xf32>
    %cst_26 = arith.constant 1.000000e+00 : f32
    %30 = vector.broadcast %cst_26 : f32 to vector<4x128xf32>
    %31 = arith.addf %30, %29 : vector<4x128xf32>
    %32 = arith.divf %30, %31 : vector<4x128xf32>
    %33 = vector.extract_strided_slice %26 {offsets = [0, 128], sizes = [4, 128], strides = [1, 1]} : vector<4x512xf32> to vector<4x128xf32>
    %34 = arith.negf %33 : vector<4x128xf32>
    %35 = math.exp %34 : vector<4x128xf32>
    %cst_27 = arith.constant 1.000000e+00 : f32
    %36 = vector.broadcast %cst_27 : f32 to vector<4x128xf32>
    %37 = arith.addf %36, %35 : vector<4x128xf32>
    %38 = arith.divf %36, %37 : vector<4x128xf32>
    %39 = vector.extract_strided_slice %26 {offsets = [0, 256], sizes = [4, 128], strides = [1, 1]} : vector<4x512xf32> to vector<4x128xf32>
    %40 = math.tanh %39 : vector<4x128xf32>
    %41 = vector.extract_strided_slice %26 {offsets = [0, 384], sizes = [4, 128], strides = [1, 1]} : vector<4x512xf32> to vector<4x128xf32>
    %42 = arith.negf %41 : vector<4x128xf32>
    %43 = math.exp %42 : vector<4x128xf32>
    %cst_28 = arith.constant 1.000000e+00 : f32
    %44 = vector.broadcast %cst_28 : f32 to vector<4x128xf32>
    %45 = arith.addf %44, %43 : vector<4x128xf32>
    %46 = arith.divf %44, %45 : vector<4x128xf32>
    %47 = arith.mulf %38, %23 : vector<4x128xf32>
    %48 = arith.mulf %32, %40 : vector<4x128xf32>
    %49 = arith.addf %47, %48 : vector<4x128xf32>
    %50 = math.tanh %49 : vector<4x128xf32>
    %51 = arith.mulf %46, %50 : vector<4x128xf32>
    %c0_29 = arith.constant 0 : index
    %c0_30 = arith.constant 0 : index
    %52 = vector.load %arg11[%c0_29, %c0_30] : memref<1x64xf32, #tpu.memory_space<vmem>>, vector<1x64xf32>
    %53 = vector.extract_strided_slice %51 {offsets = [0, 0], sizes = [1, 128], strides = [1, 1]} : vector<4x128xf32> to vector<1x128xf32>
    %c0_31 = arith.constant 0 : index
    %c0_32 = arith.constant 0 : index
    %c0_33 = arith.constant 0 : index
    %54 = vector.load %arg10[%c0_31, %c0_32, %c0_33] : memref<4x128x64xf32, #tpu.memory_space<vmem>>, vector<1x128x64xf32>
    %55 = vector.shape_cast %54 : vector<1x128x64xf32> to vector<128x64xf32>
    %cst_34 = arith.constant dense<0.000000e+00> : vector<1x64xf32>
    %56 = tpu.matmul %53, %55, %cst_34 {dimension_numbers = #tpu.dot_dimension_numbers<[1], [0], [0], [1], [0, 0, 1, 1], [], []>} : vector<1x128xf32>, vector<128x64xf32>, vector<1x64xf32> -> vector<1x64xf32>
    %57 = arith.addf %52, %56 : vector<1x64xf32>
    %58 = vector.extract_strided_slice %51 {offsets = [1, 0], sizes = [1, 128], strides = [1, 1]} : vector<4x128xf32> to vector<1x128xf32>
    %c1 = arith.constant 1 : index
    %c0_35 = arith.constant 0 : index
    %c0_36 = arith.constant 0 : index
    %59 = vector.load %arg10[%c1, %c0_35, %c0_36] : memref<4x128x64xf32, #tpu.memory_space<vmem>>, vector<1x128x64xf32>
    %60 = vector.shape_cast %59 : vector<1x128x64xf32> to vector<128x64xf32>
    %cst_37 = arith.constant dense<0.000000e+00> : vector<1x64xf32>
    %61 = tpu.matmul %58, %60, %cst_37 {dimension_numbers = #tpu.dot_dimension_numbers<[1], [0], [0], [1], [0, 0, 1, 1], [], []>} : vector<1x128xf32>, vector<128x64xf32>, vector<1x64xf32> -> vector<1x64xf32>
    %62 = arith.addf %57, %61 : vector<1x64xf32>
    %63 = vector.extract_strided_slice %51 {offsets = [2, 0], sizes = [1, 128], strides = [1, 1]} : vector<4x128xf32> to vector<1x128xf32>
    %c2 = arith.constant 2 : index
    %c0_38 = arith.constant 0 : index
    %c0_39 = arith.constant 0 : index
    %64 = vector.load %arg10[%c2, %c0_38, %c0_39] : memref<4x128x64xf32, #tpu.memory_space<vmem>>, vector<1x128x64xf32>
    %65 = vector.shape_cast %64 : vector<1x128x64xf32> to vector<128x64xf32>
    %cst_40 = arith.constant dense<0.000000e+00> : vector<1x64xf32>
    %66 = tpu.matmul %63, %65, %cst_40 {dimension_numbers = #tpu.dot_dimension_numbers<[1], [0], [0], [1], [0, 0, 1, 1], [], []>} : vector<1x128xf32>, vector<128x64xf32>, vector<1x64xf32> -> vector<1x64xf32>
    %67 = arith.addf %62, %66 : vector<1x64xf32>
    %68 = vector.extract_strided_slice %51 {offsets = [3, 0], sizes = [1, 128], strides = [1, 1]} : vector<4x128xf32> to vector<1x128xf32>
    %c3 = arith.constant 3 : index
    %c0_41 = arith.constant 0 : index
    %c0_42 = arith.constant 0 : index
    %69 = vector.load %arg10[%c3, %c0_41, %c0_42] : memref<4x128x64xf32, #tpu.memory_space<vmem>>, vector<1x128x64xf32>
    %70 = vector.shape_cast %69 : vector<1x128x64xf32> to vector<128x64xf32>
    %cst_43 = arith.constant dense<0.000000e+00> : vector<1x64xf32>
    %71 = tpu.matmul %68, %70, %cst_43 {dimension_numbers = #tpu.dot_dimension_numbers<[1], [0], [0], [1], [0, 0, 1, 1], [], []>} : vector<1x128xf32>, vector<128x64xf32>, vector<1x64xf32> -> vector<1x64xf32>
    %72 = arith.addf %67, %71 : vector<1x64xf32>
    %73 = vector.extract_strided_slice %20 {offsets = [4, 0], sizes = [4, 512], strides = [1, 1]} : vector<8x512xf32> to vector<4x512xf32>
    %cst_44 = arith.constant dense<0.000000e+00> : vector<4x512xf32>
    %74 = tpu.matmul %51, %21, %cst_44 {dimension_numbers = #tpu.dot_dimension_numbers<[1], [0], [0], [1], [0, 0, 1, 1], [], []>} : vector<4x128xf32>, vector<128x512xf32>, vector<4x512xf32> -> vector<4x512xf32>
    %75 = arith.addf %73, %74 : vector<4x512xf32>
    %76 = vector.extract_strided_slice %75 {offsets = [0, 0], sizes = [4, 128], strides = [1, 1]} : vector<4x512xf32> to vector<4x128xf32>
    %77 = arith.negf %76 : vector<4x128xf32>
    %78 = math.exp %77 : vector<4x128xf32>
    %cst_45 = arith.constant 1.000000e+00 : f32
    %79 = vector.broadcast %cst_45 : f32 to vector<4x128xf32>
    %80 = arith.addf %79, %78 : vector<4x128xf32>
    %81 = arith.divf %79, %80 : vector<4x128xf32>
    %82 = vector.extract_strided_slice %75 {offsets = [0, 128], sizes = [4, 128], strides = [1, 1]} : vector<4x512xf32> to vector<4x128xf32>
    %83 = arith.negf %82 : vector<4x128xf32>
    %84 = math.exp %83 : vector<4x128xf32>
    %cst_46 = arith.constant 1.000000e+00 : f32
    %85 = vector.broadcast %cst_46 : f32 to vector<4x128xf32>
    %86 = arith.addf %85, %84 : vector<4x128xf32>
    %87 = arith.divf %85, %86 : vector<4x128xf32>
    %88 = vector.extract_strided_slice %75 {offsets = [0, 256], sizes = [4, 128], strides = [1, 1]} : vector<4x512xf32> to vector<4x128xf32>
    %89 = math.tanh %88 : vector<4x128xf32>
    %90 = vector.extract_strided_slice %75 {offsets = [0, 384], sizes = [4, 128], strides = [1, 1]} : vector<4x512xf32> to vector<4x128xf32>
    %91 = arith.negf %90 : vector<4x128xf32>
    %92 = math.exp %91 : vector<4x128xf32>
    %cst_47 = arith.constant 1.000000e+00 : f32
    %93 = vector.broadcast %cst_47 : f32 to vector<4x128xf32>
    %94 = arith.addf %93, %92 : vector<4x128xf32>
    %95 = arith.divf %93, %94 : vector<4x128xf32>
    %96 = arith.mulf %87, %49 : vector<4x128xf32>
    %97 = arith.mulf %81, %89 : vector<4x128xf32>
    %98 = arith.addf %96, %97 : vector<4x128xf32>
    %99 = math.tanh %98 : vector<4x128xf32>
    %100 = arith.mulf %95, %99 : vector<4x128xf32>
    %c0_48 = arith.constant 0 : index
    %c0_49 = arith.constant 0 : index
    %101 = vector.load %arg11[%c0_48, %c0_49] : memref<1x64xf32, #tpu.memory_space<vmem>>, vector<1x64xf32>
    %102 = vector.extract_strided_slice %100 {offsets = [0, 0], sizes = [1, 128], strides = [1, 1]} : vector<4x128xf32> to vector<1x128xf32>
    %c0_50 = arith.constant 0 : index
    %c0_51 = arith.constant 0 : index
    %c0_52 = arith.constant 0 : index
    %103 = vector.load %arg10[%c0_50, %c0_51, %c0_52] : memref<4x128x64xf32, #tpu.memory_space<vmem>>, vector<1x128x64xf32>
    %104 = vector.shape_cast %103 : vector<1x128x64xf32> to vector<128x64xf32>
    %cst_53 = arith.constant dense<0.000000e+00> : vector<1x64xf32>
    %105 = tpu.matmul %102, %104, %cst_53 {dimension_numbers = #tpu.dot_dimension_numbers<[1], [0], [0], [1], [0, 0, 1, 1], [], []>} : vector<1x128xf32>, vector<128x64xf32>, vector<1x64xf32> -> vector<1x64xf32>
    %106 = arith.addf %101, %105 : vector<1x64xf32>
    %107 = vector.extract_strided_slice %100 {offsets = [1, 0], sizes = [1, 128], strides = [1, 1]} : vector<4x128xf32> to vector<1x128xf32>
    %c1_54 = arith.constant 1 : index
    %c0_55 = arith.constant 0 : index
    %c0_56 = arith.constant 0 : index
    %108 = vector.load %arg10[%c1_54, %c0_55, %c0_56] : memref<4x128x64xf32, #tpu.memory_space<vmem>>, vector<1x128x64xf32>
    %109 = vector.shape_cast %108 : vector<1x128x64xf32> to vector<128x64xf32>
    %cst_57 = arith.constant dense<0.000000e+00> : vector<1x64xf32>
    %110 = tpu.matmul %107, %109, %cst_57 {dimension_numbers = #tpu.dot_dimension_numbers<[1], [0], [0], [1], [0, 0, 1, 1], [], []>} : vector<1x128xf32>, vector<128x64xf32>, vector<1x64xf32> -> vector<1x64xf32>
    %111 = arith.addf %106, %110 : vector<1x64xf32>
    %112 = vector.extract_strided_slice %100 {offsets = [2, 0], sizes = [1, 128], strides = [1, 1]} : vector<4x128xf32> to vector<1x128xf32>
    %c2_58 = arith.constant 2 : index
    %c0_59 = arith.constant 0 : index
    %c0_60 = arith.constant 0 : index
    %113 = vector.load %arg10[%c2_58, %c0_59, %c0_60] : memref<4x128x64xf32, #tpu.memory_space<vmem>>, vector<1x128x64xf32>
    %114 = vector.shape_cast %113 : vector<1x128x64xf32> to vector<128x64xf32>
    %cst_61 = arith.constant dense<0.000000e+00> : vector<1x64xf32>
    %115 = tpu.matmul %112, %114, %cst_61 {dimension_numbers = #tpu.dot_dimension_numbers<[1], [0], [0], [1], [0, 0, 1, 1], [], []>} : vector<1x128xf32>, vector<128x64xf32>, vector<1x64xf32> -> vector<1x64xf32>
    %116 = arith.addf %111, %115 : vector<1x64xf32>
    %117 = vector.extract_strided_slice %100 {offsets = [3, 0], sizes = [1, 128], strides = [1, 1]} : vector<4x128xf32> to vector<1x128xf32>
    %c3_62 = arith.constant 3 : index
    %c0_63 = arith.constant 0 : index
    %c0_64 = arith.constant 0 : index
    %118 = vector.load %arg10[%c3_62, %c0_63, %c0_64] : memref<4x128x64xf32, #tpu.memory_space<vmem>>, vector<1x128x64xf32>
    %119 = vector.shape_cast %118 : vector<1x128x64xf32> to vector<128x64xf32>
    %cst_65 = arith.constant dense<0.000000e+00> : vector<1x64xf32>
    %120 = tpu.matmul %117, %119, %cst_65 {dimension_numbers = #tpu.dot_dimension_numbers<[1], [0], [0], [1], [0, 0, 1, 1], [], []>} : vector<1x128xf32>, vector<128x64xf32>, vector<1x64xf32> -> vector<1x64xf32>
    %121 = arith.addf %116, %120 : vector<1x64xf32>
    %122 = tpu.concatenate %72, %121 in 0 : vector<1x64xf32>, vector<1x64xf32> -> vector<2x64xf32>
    %c0_66 = arith.constant 0 : index
    %c0_67 = arith.constant 0 : index
    %123 = vector.load %arg12[%c0_66, %c0_67] : memref<64x128xf32, #tpu.memory_space<vmem>>, vector<64x128xf32>
    %cst_68 = arith.constant dense<0.000000e+00> : vector<2x128xf32>
    %124 = tpu.matmul %14, %123, %cst_68 {dimension_numbers = #tpu.dot_dimension_numbers<[1], [0], [0], [1], [0, 0, 1, 1], [], []>} : vector<2x64xf32>, vector<64x128xf32>, vector<2x128xf32> -> vector<2x128xf32>
    %c0_69 = arith.constant 0 : index
    %c0_70 = arith.constant 0 : index
    %125 = vector.load %arg13[%c0_69, %c0_70] : memref<64x128xf32, #tpu.memory_space<vmem>>, vector<64x128xf32>
    %cst_71 = arith.constant dense<0.000000e+00> : vector<2x128xf32>
    %126 = tpu.matmul %122, %125, %cst_71 {dimension_numbers = #tpu.dot_dimension_numbers<[1], [0], [0], [1], [0, 0, 1, 1], [], []>} : vector<2x64xf32>, vector<64x128xf32>, vector<2x128xf32> -> vector<2x128xf32>
    %127 = arith.addf %124, %126 : vector<2x128xf32>
    %c0_72 = arith.constant 0 : index
    %c0_73 = arith.constant 0 : index
    %128 = vector.load %arg14[%c0_72, %c0_73] : memref<1x128xf32, #tpu.memory_space<vmem>>, vector<1x128xf32>
    %129 = vector.broadcast %128 : vector<1x128xf32> to vector<2x128xf32>
    %130 = arith.addf %127, %129 : vector<2x128xf32>
    %c0_74 = arith.constant 0 : index
    %c0_75 = arith.constant 0 : index
    %131 = vector.load %arg15[%c0_74, %c0_75] : memref<2x128xf32, #tpu.memory_space<vmem>>, vector<2x128xf32>
    tpu.vector_store %arg15[%c0_74, %c0_75], %130 {strides = array<i32>} : memref<2x128xf32, #tpu.memory_space<vmem>>, vector<2x128xf32>,
    return
  }
}

</mosaic_0001>

<bundles_post_ra>
// kernel: cnn2rnn_forward.1
= control target key start
LH: loop header
LB: loop body
LE: loop exit
PB: predicated region body
PF: predicated region fallthrough
CT: control target
= control target key end

     0   :  { %s3316_s0 = inlined_call_operand.vmem [shape: f32[512,32], index: 0, kind: input, shape index: {}]   ;;  %s3317_s1 = inlined_call_operand.vmem [shape: f32[2,512], index: 1, kind: input, shape index: {}]   ;;  %s3318_s2 = inlined_call_operand.vmem [shape: f32[32,8], index: 2, kind: input, shape index: {}]   ;;  %s3319_s3 = inlined_call_operand.vmem [shape: f32[1,8], index: 3, kind: input, shape index: {}]   ;;  %s3320_s4 = inlined_call_operand.vmem [shape: f32[8,64], index: 4, kind: input, shape index: {}]   ;;  %s3321_s5 = inlined_call_operand.vmem [shape: f32[1,64], index: 5, kind: input, shape index: {}]   ;;  %s3322_s6 = inlined_call_operand.vmem [shape: f32[8,24], index: 6, kind: input, shape index: {}]   ;;  %s3323_s7 = inlined_call_operand.vmem [shape: f32[24,512], index: 7, kind: input, shape index: {}]   ;;  %s3324_s8 = inlined_call_operand.vmem [shape: f32[128,512], index: 8, kind: input, shape index: {}]   ;;  %s3325_s9 = inlined_call_operand.vmem [shape: f32[1,512], index: 9, kind: input, shape index: {}]   ;;  %s3326_s10 = inlined_call_operand.vmem [shape: f32[4,128,64], index: 10, kind: input, shape index: {}]   ;;  %s3327_s11 = inlined_call_operand.vmem [shape: f32[1,64], index: 11, kind: input, shape index: {}]   ;;  %s3328_s12 = inlined_call_operand.vmem [shape: f32[64,128], index: 12, kind: input, shape index: {}]   ;;  %s3329_s13 = inlined_call_operand.vmem [shape: f32[64,128], index: 13, kind: input, shape index: {}]   ;;  %s3330_s14 = inlined_call_operand.vmem [shape: f32[1,128], index: 14, kind: input, shape index: {}]   ;;  %s3331_s15 = inlined_call_operand.hbm [shape: f32[2,128], index: 15, kind: output, shape index: {}]  }
   0x1   :  { %v118_v0 = vld [vmem:[%s3318_s2 + $0x18] sm:$0xff]  ;;  %v117_v1 = vld [vmem:[%s3318_s2 + $0x10] sm:$0xff]  ;;  %v116_v2 = vld [vmem:[%s3318_s2 + $0x8] sm:$0xff] }
   0x2   :  { %328 = vmatpush.msra.mxu0 %v118_v0  ;;  %1656 = vmatpush.msra.mxu1 %v118_v0  ;;  %v115_v3 = vld [vmem:[%s3318_s2] sm:$0xff] }
   0x3   :  { %1657 = vmatpush.msra.mxu2 %v118_v0  ;;  %1658 = vmatpush.msra.mxu3 %v118_v0 }
   0x4   :  { %329 = vmatpush.msra.mxu0 %v117_v1  ;;  %1659 = vmatpush.msra.mxu1 %v117_v1 }
   0x5   :  { %1660 = vmatpush.msra.mxu2 %v117_v1  ;;  %1661 = vmatpush.msra.mxu3 %v117_v1 }
   0x6   :  { %20 = vsyncpa [#allocation3], 0  ;;  %330 = vmatpush.msra.mxu0 %v116_v2  ;;  %v51_v4 = vld [vmem:[%s3316_s0] sm:$0xff]  ;;  %vm123_vm0 = vcmask 261120   ;;  %1662 = vmatpush.msra.mxu1 %v116_v2  ;;  %v52_v5 = vld [vmem:[%s3316_s0 + $0x8] sm:$0xff]  ;;  %vm732_vm1 = vcmask 195584  }
   0x7   :  { %1663 = vmatpush.msra.mxu2 %v116_v2  ;;  %1664 = vmatpush.msra.mxu3 %v116_v2  ;;  %v53_v6 = vld [vmem:[%s3316_s0 + $0x10] sm:$0xff]  ;;  %v54_v7 = vld [vmem:[%s3316_s0 + $0x18] sm:$0xff]  ;;  %v55_v8 = vld [vmem:[%s3316_s0 + $0x20] sm:$0xff]  ;;  %vm685_vm2 = vcmask 64512   ;;  %s1522_s19 = sshll.u32 %s3331_s15, 4  ;;  %s1523_s19 = int_to_ptr.hbm [resolvable:$true] %s1522_s19 }
   0x8   :  { %331 = vmatpush.msra.mxu0 %v115_v3  ;;  %1665 = vmatpush.msra.mxu1 %v115_v3  ;;  %v56_v9 = vld [vmem:[%s3316_s0 + $0x28] sm:$0xff]  ;;  %v57_v10 = vld [vmem:[%s3316_s0 + $0x30] sm:$0xff]  ;;  %v58_v11 = vld [vmem:[%s3316_s0 + $0x38] sm:$0xff] }
   0x9   :  { %1531 = vmatmul.msk.f32.vlgmr.msra.gmra.mxu0 %vm123_vm0, %v51_v4  ;;  %1666 = vmatpush.msra.mxu2 %v115_v3  ;;  %v59_v12 = vld [vmem:[%s3316_s0 + $0x40] sm:$0xff]  ;;  %v60_v13 = vld [vmem:[%s3316_s0 + $0x48] sm:$0xff]  ;;  %v61_v14 = vld [vmem:[%s3316_s0 + $0x50] sm:$0xff] }
   0xa   :  { %1667 = vmatpush.msra.mxu3 %v115_v3  ;;  %v62_v15 = vld [vmem:[%s3316_s0 + $0x58] sm:$0xff]  ;;  %v63_v17 = vld [vmem:[%s3316_s0 + $0x60] sm:$0xff]  ;;  %v64_v19 = vld [vmem:[%s3316_s0 + $0x68] sm:$0xff] }
   0xb   :  { %v98_v16 = vld [vmem:[%s3316_s0 + $0x178] sm:$0xff]  ;;  %v99_v18 = vld [vmem:[%s3316_s0 + $0x180] sm:$0xff]  ;;  %v89_v20 = vld [vmem:[%s3316_s0 + $0x130] sm:$0xff] }
   0xc   :  { %1578 = vmatmul.msk.f32.vlgmr.msra.gmra.mxu2 %vm123_vm0, %v98_v16  ;;  %1569 = vmatmul.msk.f32.vlgmr.msra.gmra.mxu1 %vm123_vm0, %v89_v20  ;;  %v100_v21 = vld [vmem:[%s3316_s0 + $0x188] sm:$0xff]  ;;  %v65_v22 = vld [vmem:[%s3316_s0 + $0x70] sm:$0xff]  ;;  %v90_v23 = vld [vmem:[%s3316_s0 + $0x138] sm:$0xff] }
   0xd   :  { %v101_v24 = vld [vmem:[%s3316_s0 + $0x190] sm:$0xff]  ;;  %v66_v26 = vld [vmem:[%s3316_s0 + $0x78] sm:$0xff]  ;;  %v91_v27 = vld [vmem:[%s3316_s0 + $0x140] sm:$0xff] }
   0xe   :  { %v109_v25 = vld [vmem:[%s3316_s0 + $0x1d0] sm:$0xff]  ;;  %v102_v28 = vld [vmem:[%s3316_s0 + $0x198] sm:$0xff]  ;;  %v67_v31 = vld [vmem:[%s3316_s0 + $0x80] sm:$0xff] }
   0xf   :  { %1589 = vmatmul.msk.f32.vlgmr.msra.gmra.mxu3 %vm123_vm0, %v109_v25  ;;  %v110_v29 = vld [vmem:[%s3316_s0 + $0x1d8] sm:$0xff]  ;;  %v92_v32 = vld [vmem:[%s3316_s0 + $0x148] sm:$0xff]  ;;  %v103_v33 = vld [vmem:[%s3316_s0 + $0x1a0] sm:$0xff] }
  0x10   :  { %v111_v34 = vld [vmem:[%s3316_s0 + $0x1e0] sm:$0xff]  ;;  %v68_v36 = vld [vmem:[%s3316_s0 + $0x88] sm:$0xff]  ;;  %v93_v37 = vld [vmem:[%s3316_s0 + $0x150] sm:$0xff] }
  0x11   :  { %1532 = vmatmul.msk.f32.gmra.mxu0 %vm123_vm0, %v52_v5  ;;  %v104_v38 = vld [vmem:[%s3316_s0 + $0x1a8] sm:$0xff]  ;;  %v69_v41 = vld [vmem:[%s3316_s0 + $0x90] sm:$0xff]  ;;  %v94_v42 = vld [vmem:[%s3316_s0 + $0x158] sm:$0xff] }
  0x12   :  { %v112_v39 = vld [vmem:[%s3316_s0 + $0x1e8] sm:$0xff]  ;;  %v105_v43 = vld [vmem:[%s3316_s0 + $0x1b0] sm:$0xff]  ;;  %v70_v46 = vld [vmem:[%s3316_s0 + $0x98] sm:$0xff] }
  0x13   :  { %v113_v44 = vld [vmem:[%s3316_s0 + $0x1f0] sm:$0xff]  ;;  %v95_v47 = vld [vmem:[%s3316_s0 + $0x160] sm:$0xff]  ;;  %v106_v48 = vld [vmem:[%s3316_s0 + $0x1b8] sm:$0xff] }
  0x14   :  { %1579 = vmatmul.msk.f32.gmra.mxu2 %vm123_vm0, %v99_v18  ;;  %1570 = vmatmul.msk.f32.gmra.mxu1 %vm123_vm0, %v90_v23  ;;  %v114_v49 = vld [vmem:[%s3316_s0 + $0x1f8] sm:$0xff]  ;;  %v71_v51 = vld [vmem:[%s3316_s0 + $0xa0] sm:$0xff]  ;;  %v96_v52 = vld [vmem:[%s3316_s0 + $0x168] sm:$0xff] }
  0x15   :  { %v107_v53 = vld [vmem:[%s3316_s0 + $0x1c0] sm:$0xff]  ;;  %v72_v55 = vld [vmem:[%s3316_s0 + $0xa8] sm:$0xff]  ;;  %v97_v56 = vld [vmem:[%s3316_s0 + $0x170] sm:$0xff] }
  0x16   :  { %v108_v57 = vld [vmem:[%s3316_s0 + $0x1c8] sm:$0xff]  ;;  %v73_v59 = vld [vmem:[%s3316_s0 + $0xb0] sm:$0xff]  ;;  %v74_v61 = vld [vmem:[%s3316_s0 + $0xb8] sm:$0xff] }
  0x17   :  { %1590 = vmatmul.msk.f32.gmra.mxu3 %vm123_vm0, %v110_v29  ;;  %v75_v63 = vld [vmem:[%s3316_s0 + $0xc0] sm:$0xff]  ;;  %v76_v1 = vld [vmem:[%s3316_s0 + $0xc8] sm:$0xff]  ;;  %v77_v3 = vld [vmem:[%s3316_s0 + $0xd0] sm:$0xff] }
  0x18   :  { %v78_v5 = vld [vmem:[%s3316_s0 + $0xd8] sm:$0xff]  ;;  %v81_v16 = vld [vmem:[%s3316_s0 + $0xf0] sm:$0xff] }
  0x19   :  { %1533 = vmatmul.msk.f32.gmra.mxu0 %vm123_vm0, %v53_v6 }
  0x1c   :  { %1580 = vmatmul.msk.f32.gmra.mxu2 %vm123_vm0, %v100_v21  ;;  %1571 = vmatmul.msk.f32.gmra.mxu1 %vm123_vm0, %v91_v27  ;;  %v82_v21 = vld [vmem:[%s3316_s0 + $0xf8] sm:$0xff] }
  0x1f   :  { %1591 = vmatmul.msk.f32.gmra.mxu3 %vm123_vm0, %v111_v34 }
  0x21   :  { %1534 = vmatmul.msk.f32.gmra.mxu0 %vm123_vm0, %v54_v7 }
  0x24   :  { %1581 = vmatmul.msk.f32.gmra.mxu2 %vm123_vm0, %v101_v24  ;;  %1572 = vmatmul.msk.f32.gmra.mxu1 %vm123_vm0, %v92_v32 }
  0x27   :  { %1592 = vmatmul.msk.f32.gmra.mxu3 %vm123_vm0, %v112_v39 }
  0x29   :  { %1535 = vmatmul.msk.f32.gmra.mxu0 %vm123_vm0, %v55_v8  ;;  %v79_v8 = vld [vmem:[%s3316_s0 + $0xe0] sm:$0xff] }
  0x2c   :  { %1582 = vmatmul.msk.f32.gmra.mxu2 %vm123_vm0, %v102_v28  ;;  %1573 = vmatmul.msk.f32.gmra.mxu1 %vm123_vm0, %v93_v37 }
  0x2f   :  { %1593 = vmatmul.msk.f32.gmra.mxu3 %vm123_vm0, %v113_v44 }
  0x31   :  { %1536 = vmatmul.msk.f32.gmra.mxu0 %vm123_vm0, %v56_v9 }
  0x34   :  { %1583 = vmatmul.msk.f32.gmra.mxu2 %vm123_vm0, %v103_v33  ;;  %1574 = vmatmul.msk.f32.gmra.mxu1 %vm123_vm0, %v94_v42 }
  0x37   :  { %1594 = vmatmul.msk.f32.gmra.mxu3 %vm123_vm0, %v114_v49 }
  0x39   :  { %1537 = vmatmul.msk.f32.gmra.mxu0 %vm123_vm0, %v57_v10 }
  0x3c   :  { %1584 = vmatmul.msk.f32.gmra.mxu2 %vm123_vm0, %v104_v38  ;;  %1575 = vmatmul.msk.f32.gmra.mxu1 %vm123_vm0, %v95_v47  ;;  %v83_v38 = vld [vmem:[%s3316_s0 + $0x100] sm:$0xff] }
  0x41   :  { %1538 = vmatmul.msk.f32.gmra.mxu0 %vm123_vm0, %v58_v11 }
  0x44   :  { %1585 = vmatmul.msk.f32.gmra.mxu2 %vm123_vm0, %v105_v43  ;;  %1576 = vmatmul.msk.f32.gmra.mxu1 %vm123_vm0, %v96_v52 }
  0x49   :  { %1539 = vmatmul.msk.f32.gmra.mxu0 %vm123_vm0, %v59_v12  ;;  %v80_v12 = vld [vmem:[%s3316_s0 + $0xe8] sm:$0xff] }
  0x4c   :  { %1586 = vmatmul.msk.f32.gmra.mxu2 %vm123_vm0, %v106_v48  ;;  %1577 = vmatmul.msk.f32.gmra.mxu1 %vm123_vm0, %v97_v56 }
  0x51   :  { %1540 = vmatmul.msk.f32.gmra.mxu0 %vm123_vm0, %v60_v13 }
  0x54   :  { %1587 = vmatmul.msk.f32.gmra.mxu2 %vm123_vm0, %v107_v53 }
  0x59   :  { %1541 = vmatmul.msk.f32.gmra.mxu0 %vm123_vm0, %v61_v14 }
  0x5c   :  { %1588 = vmatmul.msk.f32.gmra.mxu2 %vm123_vm0, %v108_v57 }
  0x61   :  { %1542 = vmatmul.msk.f32.gmra.mxu0 %vm123_vm0, %v62_v15 }
  0x69   :  { %1543 = vmatmul.msk.f32.gmra.mxu0 %vm123_vm0, %v63_v17 }
  0x71   :  { %1544 = vmatmul.msk.f32.gmra.mxu0 %vm123_vm0, %v64_v19  ;;  %v2084_v19 = vld [vmem:[%s3319_s3] ss:$0 sm:$0xff] }
  0x79   :  { %1545 = vmatmul.msk.f32.gmra.mxu0 %vm123_vm0, %v65_v22 }
  0x81   :  { %1546 = vmatmul.msk.f32.gmra.mxu0 %vm123_vm0, %v66_v26 }
  0x86   :  { %v1929_v30 = vpop.f32.mrf.mxu0 }
  0x89   :  { %1547 = vmatmul.msk.f32.gmra.mxu0 %vm123_vm0, %v67_v31  ;;  %v2061_v9 = vpop.f32.mrf.mxu1 }
  0x8e   :  { %v1947_v35 = vpop.f32.mrf.mxu0 }
  0x8f   :  { %v474_v6 = vpop.f32.mrf.mxu2 }
  0x90   :  { %v475_v27 = vadd.f32 %v2084_v19, %v474_v6  ;;  %v337_v6 = vadd.f32 %v2084_v19, %v1947_v35 }
  0x91   :  { %1548 = vmatmul.msk.f32.gmra.mxu0 %vm123_vm0, %v68_v36  ;;  %v2069_v13 = vpop.f32.mrf.mxu1 }
  0x92   :  { %v2091_v24 = vpop.f32.mrf.mxu3  ;;  %v572_v31 = vmax.f32 %v475_v27, 0.0 }
  0x94   :  { %640 = vmatpush.msrb.mxu3 %v572_v31 }
  0x96   :  { %v1965_v40 = vpop.f32.mrf.mxu0 }
  0x97   :  { %v2063_v10 = vpop.f32.mrf.mxu2 }
  0x99   :  { %1549 = vmatmul.msk.f32.gmra.mxu0 %vm123_vm0, %v69_v41  ;;  %v2077_v17 = vpop.f32.mrf.mxu1 }
  0x9a   :  { %v2108_v42 = vpop.f32.mrf.mxu3 }
  0x9e   :  { %v1983_v45 = vpop.f32.mrf.mxu0 }
  0x9f   :  { %v2071_v14 = vpop.f32.mrf.mxu2 }
  0xa1   :  { %1550 = vmatmul.msk.f32.gmra.mxu0 %vm123_vm0, %v70_v46  ;;  %v2097_v32 = vpop.f32.mrf.mxu1 }
  0xa6   :  { %v2001_v50 = vpop.f32.mrf.mxu0 }
  0xa7   :  { %v2079_v18 = vpop.f32.mrf.mxu2 }
  0xa9   :  { %1551 = vmatmul.msk.f32.gmra.mxu0 %vm123_vm0, %v71_v51  ;;  %v2113_v48 = vpop.f32.mrf.mxu1 }
  0xae   :  { %v2015_v54 = vpop.f32.mrf.mxu0 }
  0xaf   :  { %v2099_v33 = vpop.f32.mrf.mxu2 }
  0xb1   :  { %1552 = vmatmul.msk.f32.gmra.mxu0 %vm123_vm0, %v72_v55  ;;  %v84_v55 = vld [vmem:[%s3316_s0 + $0x108] sm:$0xff] }
  0xb6   :  { %v2029_v58 = vpop.f32.mrf.mxu0 }
  0xb7   :  { %v2115_v49 = vpop.f32.mrf.mxu2  ;;  %v352_v56 = vadd.f32 %v2084_v19, %v2029_v58  ;;  %v343_v58 = vadd.f32 %v2084_v19, %v1983_v45 }
  0xb9   :  { %1553 = vmatmul.msk.f32.gmra.mxu0 %vm123_vm0, %v73_v59  ;;  %v513_v59 = vpop.f32.mrf.mxu3  ;;  %v528_v45 = vmax.f32 %v343_v58, 0.0 }
  0xbe   :  { %v2035_v60 = vpop.f32.mrf.mxu0 }
  0xbf   :  { %v355_v51 = vadd.f32 %v2084_v19, %v2035_v60 }
  0xc1   :  { %1554 = vmatmul.msk.f32.gmra.mxu0 %vm123_vm0, %v74_v61  ;;  %v349_v61 = vadd.f32 %v2084_v19, %v2015_v54  ;;  %v532_v60 = vmax.f32 %v355_v51, 0.0  ;;  %v85_v54 = vld [vmem:[%s3316_s0 + $0x110] sm:$0xff] }
  0xc6   :  { %v357_v62 = vpop.f32.mrf.mxu0 }
  0xc7   :  { %v358_v46 = vadd.f32 %v2084_v19, %v357_v62  ;;  %v346_v62 = vadd.f32 %v2084_v19, %v2001_v50 }
  0xc9   :  { %1555 = vmatmul.msk.f32.gmra.mxu0 %vm123_vm0, %v75_v63  ;;  %v533_v57 = vmax.f32 %v358_v46, 0.0  ;;  %v531_v63 = vmax.f32 %v352_v56, 0.0  ;;  %v529_v50 = vmax.f32 %v346_v62, 0.0  ;;  %v514_v46 = vadd.f32 %v2084_v19, %v513_v59 }
  0xca   :  { %v457_v59 = vadd.f32 %v2084_v19, %v2097_v32  ;;  %v451_v32 = vadd.f32 %v2084_v19, %v2069_v13  ;;  %v490_v13 = vadd.f32 %v2084_v19, %v2115_v49  ;;  %v481_v49 = vadd.f32 %v2084_v19, %v2071_v14 }
  0xce   :  { %v360_v0 = vpop.f32.mrf.mxu0 }
  0xcf   :  { %v361_v43 = vadd.f32 %v2084_v19, %v360_v0  ;;  %v462_v0 = vpop.f32.mrf.mxu1 }
  0xd1   :  { %1556 = vmatmul.msk.f32.gmra.mxu0 %vm123_vm0, %v76_v1  ;;  %v534_v52 = vmax.f32 %v361_v43, 0.0  ;;  %v2131_v1 = vpop.f32.mrf.mxu2  ;;  %v511_v43 = vadd.f32 %v2084_v19, %v2108_v42  ;;  %v460_v42 = vadd.f32 %v2084_v19, %v2113_v48 }
  0xd3   :  { %v567_v48 = vmax.f32 %v460_v42, 0.0 }
  0xd6   :  { %v363_v2 = vpop.f32.mrf.mxu0 }
  0xd7   :  { %v364_v39 = vadd.f32 %v2084_v19, %v363_v2  ;;  %v530_v2 = vmax.f32 %v349_v61, 0.0 }
  0xd9   :  { %1557 = vmatmul.msk.f32.gmra.mxu0 %vm123_vm0, %v77_v3  ;;  %v535_v47 = vmax.f32 %v364_v39, 0.0 }
  0xde   :  { %v366_v4 = vpop.f32.mrf.mxu0 }
  0xdf   :  { %v367_v34 = vadd.f32 %v2084_v19, %v366_v4  ;;  %v340_v4 = vadd.f32 %v2084_v19, %v1965_v40 }
  0xe1   :  { %1558 = vmatmul.msk.f32.gmra.mxu0 %vm123_vm0, %v78_v5  ;;  %v536_v44 = vmax.f32 %v367_v34, 0.0  ;;  %v516_v5 = vpop.f32.mrf.mxu3 }
  0xe2   :  { %v517_v34 = vadd.f32 %v2084_v19, %v516_v5  ;;  %v566_v5 = vmax.f32 %v457_v59, 0.0 }
  0xe4   :  { %v586_v51 = vmax.f32 %v517_v34, 0.0 }
  0xe6   :  { %v369_v7 = vpop.f32.mrf.mxu0 }
  0xe7   :  { %v370_v28 = vadd.f32 %v2084_v19, %v369_v7  ;;  %v334_v7 = vadd.f32 %v2084_v19, %v1929_v30 }
  0xe9   :  { %1559 = vmatmul.msk.f32.gmra.mxu0 %vm123_vm0, %v79_v8  ;;  %v537_v41 = vmax.f32 %v370_v28, 0.0  ;;  %v527_v8 = vmax.f32 %v340_v4, 0.0  ;;  %v525_v35 = vmax.f32 %v334_v7, 0.0 }
  0xee   :  { %v372_v11 = vpop.f32.mrf.mxu0 }
  0xef   :  { %v373_v25 = vadd.f32 %v2084_v19, %v372_v11  ;;  %v465_v11 = vpop.f32.mrf.mxu1 }
  0xf1   :  { %1560 = vmatmul.msk.f32.gmra.mxu0 %vm123_vm0, %v80_v12  ;;  %v538_v36 = vmax.f32 %v373_v25, 0.0  ;;  %v495_v12 = vpop.f32.mrf.mxu2 }
  0xf6   :  { %v375_v15 = vpop.f32.mrf.mxu0 }
  0xf7   :  { %v376_v22 = vadd.f32 %v2084_v19, %v375_v15  ;;  %v526_v15 = vmax.f32 %v337_v6, 0.0  ;;  %v496_v6 = vadd.f32 %v2084_v19, %v495_v12 }
  0xf9   :  { %1561 = vmatmul.msk.f32.gmra.mxu0 %vm123_vm0, %v81_v16  ;;  %v539_v29 = vmax.f32 %v376_v22, 0.0  ;;  %v86_v16 = vld [vmem:[%s3316_s0 + $0x118] sm:$0xff]  ;;  %v498_v30 = vpop.f32.mrf.mxu2 }
  0xfe   :  { %v378_v20 = vpop.f32.mrf.mxu0 }
  0xff   :  { %v379_v23 = vadd.f32 %v2084_v19, %v378_v20  ;;  %v519_v20 = vpop.f32.mrf.mxu3 }
 0x100   :  { %v520_v27 = vadd.f32 %v2084_v19, %v519_v20 }
 0x101   :  { %v540_v26 = vmax.f32 %v379_v23, 0.0  ;;  %1562 = vmatmul.msk.f32.gmra.mxu0 %vm123_vm0, %v82_v21  ;;  %v468_v21 = vpop.f32.mrf.mxu1  ;;  %v87_v23 = vld [vmem:[%s3316_s0 + $0x120] sm:$0xff]  ;;  %v501_v31 = vpop.f32.mrf.mxu2 }
 0x102   :  { %v502_v4 = vadd.f32 %v2084_v19, %v501_v31 }
 0x103   :  { %600 = vmatpush.msrb.mxu1 %v540_v26 }
 0x104   :  { %v581_v7 = vmax.f32 %v502_v4, 0.0 }
 0x105   :  { %601 = vmatpush.msrb.mxu1 %v539_v29 }
 0x106   :  { %v2102_v37 = vpop.f32.mrf.mxu0 }
 0x107   :  { %602 = vmatpush.msrb.mxu1 %v538_v36  ;;  %v522_v25 = vpop.f32.mrf.mxu3 }
 0x108   :  { %v523_v26 = vadd.f32 %v2084_v19, %v522_v25  ;;  %v478_v25 = vadd.f32 %v2084_v19, %v2063_v10 }
 0x109   :  { %1563 = vmatmul.msk.f32.gmra.mxu0 %vm123_vm0, %v83_v38  ;;  %603 = vmatpush.msrb.mxu1 %v537_v41  ;;  %v471_v28 = vpop.f32.mrf.mxu1  ;;  %v587_v38 = vmax.f32 %v520_v27, 0.0  ;;  %v88_v41 = vld [vmem:[%s3316_s0 + $0x128] sm:$0xff] }
 0x10a   :  { %v588_v29 = vmax.f32 %v523_v26, 0.0  ;;  %v472_v36 = vadd.f32 %v2084_v19, %v471_v28  ;;  %v573_v28 = vmax.f32 %v478_v25, 0.0 }
 0x10b   :  { %604 = vmatpush.msrb.mxu1 %v536_v44  ;;  %v466_v44 = vadd.f32 %v2084_v19, %v465_v11  ;;  %v493_v11 = vadd.f32 %v2084_v19, %v2131_v1  ;;  %v484_v1 = vadd.f32 %v2084_v19, %v2079_v18 }
 0x10c   :  { %v571_v56 = vmax.f32 %v472_v36, 0.0 }
 0x10d   :  { %605 = vmatpush.msrb.mxu1 %v535_v47  ;;  %v469_v47 = vadd.f32 %v2084_v19, %v468_v21  ;;  %v569_v62 = vmax.f32 %v466_v44, 0.0  ;;  %v487_v21 = vadd.f32 %v2084_v19, %v2099_v33  ;;  %v575_v26 = vmax.f32 %v484_v1, 0.0 }
 0x10e   :  { %v2119_v53 = vpop.f32.mrf.mxu0  ;;  %641 = vmatpush.msrb.mxu3 %v571_v56  ;;  %v574_v33 = vmax.f32 %v481_v49, 0.0 }
 0x10f   :  { %606 = vmatpush.msrb.mxu1 %v534_v52  ;;  %v508_v52 = vadd.f32 %v2084_v19, %v2091_v24  ;;  %v570_v61 = vmax.f32 %v469_v47, 0.0 }
 0x111   :  { %1564 = vmatmul.msk.f32.gmra.mxu0 %vm123_vm0, %v84_v55  ;;  %607 = vmatpush.msrb.mxu1 %v533_v57  ;;  %v463_v55 = vadd.f32 %v2084_v19, %v462_v0  ;;  %v585_v57 = vmax.f32 %v514_v46, 0.0  ;;  %v504_v0 = vpop.f32.mrf.mxu2 }
 0x112   :  { %642 = vmatpush.msrb.mxu3 %v570_v61  ;;  %v505_v58 = vadd.f32 %v2084_v19, %v504_v0 }
 0x113   :  { %608 = vmatpush.msrb.mxu1 %v532_v60  ;;  %v584_v60 = vmax.f32 %v511_v43, 0.0  ;;  %v568_v24 = vmax.f32 %v463_v55, 0.0 }
 0x114   :  { %643 = vmatpush.msrb.mxu3 %v569_v62 }
 0x115   :  { %609 = vmatpush.msrb.mxu1 %v531_v63  ;;  %v583_v63 = vmax.f32 %v508_v52, 0.0 }
 0x116   :  { %v2135_v3 = vpop.f32.mrf.mxu0  ;;  %644 = vmatpush.msrb.mxu3 %v568_v24 }
 0x117   :  { %610 = vmatpush.msrb.mxu1 %v530_v2  ;;  %v454_v2 = vadd.f32 %v2084_v19, %v2077_v17  ;;  %v448_v17 = vadd.f32 %v2084_v19, %v2061_v9  ;;  %v578_v9 = vmax.f32 %v493_v11, 0.0 }
 0x118   :  { %645 = vmatpush.msrb.mxu3 %v567_v48 }
 0x119   :  { %1565 = vmatmul.msk.f32.gmra.mxu0 %vm123_vm0, %v85_v54  ;;  %611 = vmatpush.msrb.mxu1 %v529_v50  ;;  %v582_v50 = vmax.f32 %v505_v58, 0.0  ;;  %v563_v12 = vmax.f32 %v448_v17, 0.0 }
 0x11a   :  { %646 = vmatpush.msrb.mxu3 %v566_v5 }
 0x11b   :  { %612 = vmatpush.msrb.mxu1 %v528_v45  ;;  %v499_v45 = vadd.f32 %v2084_v19, %v498_v30  ;;  %v577_v30 = vmax.f32 %v490_v13, 0.0 }
 0x11d   :  { %613 = vmatpush.msrb.mxu1 %v527_v8  ;;  %v565_v8 = vmax.f32 %v454_v2, 0.0  ;;  %v589_v2 = vld [vmem:[%s3317_s1] sm:$0xff] }
 0x11e   :  { %v2147_v40 = vpop.f32.mrf.mxu0  ;;  %591 = vst [vmem:[#allocation1] ss:$4 sm:$0xff] %v589_v2  ;;  %v2394_v2 = vld [vmem:[%s3324_s8 + $0x150] sm:$0xff] }
 0x11f   :  { %614 = vmatpush.msrb.mxu1 %v526_v15  ;;  %v580_v15 = vmax.f32 %v499_v45, 0.0  ;;  %647 = vmatpush.msrb.mxu3 %v565_v8  ;;  %v388_v45 = vadd.f32 %v2084_v19, %v2135_v3 }
 0x121   :  { %1566 = vmatmul.msk.f32.gmra.mxu0 %vm123_vm0, %v86_v16  ;;  %615 = vmatpush.msrb.mxu1 %v525_v35  ;;  %v564_v16 = vmax.f32 %v451_v32, 0.0  ;;  %v579_v35 = vmax.f32 %v496_v6, 0.0  ;;  %v543_v8 = vmax.f32 %v388_v45, 0.0  ;;  %v2441_v45 = vld [vmem:[%s3324_s8 + $0xb0] sm:$0xff] }
 0x122   :  { %3396 = vst [vmem:[#allocation7_spill] sm:$0xff] %v2441_v45 }
 0x123   :  { %660 = vmatpush.msra.mxu1 %v588_v29  ;;  %648 = vmatpush.msrb.mxu3 %v564_v16 }
 0x125   :  { %661 = vmatpush.msra.mxu1 %v587_v38  ;;  %649 = vmatpush.msrb.mxu3 %v563_v12  ;;  %v593_v3 = vld.sshfl [vmem:[#allocation1 + $0x8] sm:$0xff pattern:$0x73625140]  ;;  %v595_v13 = vld.sshfl [vmem:[#allocation1 + $0x18] sm:$0xff pattern:$0x73625140] }
 0x126   :  { %v2153_v22 = vpop.f32.mrf.mxu0 }
 0x127   :  { %662 = vmatpush.msra.mxu1 %v586_v51 }
 0x129   :  { %1567 = vmatmul.msk.f32.gmra.mxu0 %vm123_vm0, %v87_v23  ;;  %663 = vmatpush.msra.mxu1 %v585_v57  ;;  %v576_v23 = vmax.f32 %v487_v21, 0.0 }
 0x12b   :  { %664 = vmatpush.msra.mxu1 %v584_v60 }
 0x12d   :  { %665 = vmatpush.msra.mxu1 %v583_v63 }
 0x12e   :  { %v2163_v39 = vpop.f32.mrf.mxu0 }
 0x12f   :  { %666 = vmatpush.msra.mxu1 %v582_v50  ;;  %v397_v48 = vadd.f32 %v2084_v19, %v2163_v39  ;;  %v394_v50 = vadd.f32 %v2084_v19, %v2153_v22  ;;  %v385_v39 = vadd.f32 %v2084_v19, %v2119_v53  ;;  %v382_v22 = vadd.f32 %v2084_v19, %v2102_v37 }
 0x131   :  { %1568 = vmatmul.msk.f32.gmra.mxu0 %vm123_vm0, %v88_v41  ;;  %667 = vmatpush.msra.mxu1 %v581_v7  ;;  %v546_v5 = vmax.f32 %v397_v48, 0.0  ;;  %v545_v7 = vmax.f32 %v394_v50, 0.0  ;;  %v542_v11 = vmax.f32 %v385_v39, 0.0  ;;  %v541_v16 = vmax.f32 %v382_v22, 0.0  ;;  %v2400_v48 = vld [vmem:[%s3324_s8 + $0x130] sm:$0xff]  ;;  %v2412_v50 = vld [vmem:[%s3324_s8 + $0x1f8] sm:$0xff] }
 0x132   :  { %v2453_v39 = vld [vmem:[%s3324_s8 + $0x90] sm:$0xff]  ;;  %v719_v22 = vld [vmem:[%s3323_s7 + $0x48] sm:$0xff] }
 0x133   :  { %668 = vmatpush.msra.mxu1 %v580_v15  ;;  %3397 = vst [vmem:[#allocation8_spill] sm:$0xff] %v2453_v39 }
 0x135   :  { %669 = vmatpush.msra.mxu1 %v579_v35 }
 0x136   :  { %v2184_v54 = vpop.f32.mrf.mxu0 }
 0x137   :  { %670 = vmatpush.msra.mxu1 %v578_v9  ;;  %v400_v0 = vadd.f32 %v2084_v19, %v2184_v54  ;;  %v391_v54 = vadd.f32 %v2084_v19, %v2147_v40  ;;  %v592_v40 = vld.sshfl [vmem:[#allocation1] sm:$0xff pattern:$0x73625140] }
 0x138   :  { %616 = vmatmul.f32.vlgmr.msrb.gmra.mxu1 %v592_v40  ;;  %v715_v40 = vld [vmem:[%s3323_s7 + $0x28] sm:$0xff] }
 0x139   :  { %671 = vmatpush.msra.mxu1 %v577_v30  ;;  %v547_v32 = vmax.f32 %v400_v0, 0.0  ;;  %v544_v17 = vmax.f32 %v391_v54, 0.0  ;;  %v2382_v0 = vld [vmem:[%s3324_s8 + $0x190] sm:$0xff]  ;;  %v2424_v54 = vld [vmem:[%s3324_s8 + $0x1d8] sm:$0xff] }
 0x13b   :  { %672 = vmatpush.msra.mxu1 %v576_v23 }
 0x13d   :  { %673 = vmatpush.msra.mxu1 %v575_v26 }
 0x13e   :  { %v402_v20 = vpop.f32.mrf.mxu0 }
 0x13f   :  { %674 = vmatpush.msra.mxu1 %v574_v33  ;;  %v403_v59 = vadd.f32 %v2084_v19, %v402_v20 }
 0x141   :  { %675 = vmatpush.msra.mxu1 %v573_v28  ;;  %v548_v4 = vmax.f32 %v403_v59, 0.0  ;;  %v718_v28 = vld [vmem:[%s3323_s7 + $0x40] sm:$0xff] }
 0x142   :  { %676 = vmatmul.f32.vlgmr.msra.gmra.mxu1 %v595_v13  ;;  %v2369_v59 = vld [vmem:[%s3324_s8] sm:$0xff]  ;;  %v2496_v13 = vld [vmem:[%s3324_s8 + $0x138] sm:$0xff] }
 0x146   :  { %v405_v27 = vpop.f32.mrf.mxu0 }
 0x147   :  { %v406_v60 = vadd.f32 %v2084_v19, %v405_v27  ;;  %v594_v27 = vld.sshfl [vmem:[#allocation1 + $0x10] sm:$0xff pattern:$0x73625140] }
 0x149   :  { %v549_v58 = vmax.f32 %v406_v60, 0.0  ;;  %v2357_v60 = vld [vmem:[%s3324_s8 + $0x20] sm:$0xff] }
 0x14e   :  { %v408_v18 = vpop.f32.mrf.mxu0 }
 0x14f   :  { %v409_v61 = vadd.f32 %v2084_v19, %v408_v18  ;;  %v714_v18 = vld [vmem:[%s3323_s7 + $0x20] sm:$0xff] }
 0x151   :  { %v550_v63 = vmax.f32 %v409_v61, 0.0  ;;  %v2345_v61 = vld [vmem:[%s3324_s8 + $0x40] sm:$0xff] }
 0x156   :  { %v411_v29 = vpop.f32.mrf.mxu0 }
 0x157   :  { %v412_v56 = vadd.f32 %v2084_v19, %v411_v29  ;;  %v720_v29 = vld [vmem:[%s3323_s7 + $0x50] sm:$0xff] }
 0x159   :  { %v551_v62 = vmax.f32 %v412_v56, 0.0  ;;  %v2333_v56 = vld [vmem:[%s3324_s8 + $0x80] sm:$0xff] }
 0x15e   :  { %v414_v31 = vpop.f32.mrf.mxu0 }
 0x15f   :  { %v415_v51 = vadd.f32 %v2084_v19, %v414_v31  ;;  %v716_v31 = vld [vmem:[%s3323_s7 + $0x30] sm:$0xff] }
 0x161   :  { %v552_v42 = vmax.f32 %v415_v51, 0.0  ;;  %v2315_v51 = vld [vmem:[%s3324_s8 + $0xe0] sm:$0xff] }
 0x166   :  { %v417_v34 = vpop.f32.mrf.mxu0 }
 0x167   :  { %v418_v46 = vadd.f32 %v2084_v19, %v417_v34  ;;  %v2255_v34 = vld [vmem:[%s3322_s6] sm:$0xff] }
 0x169   :  { %v553_v57 = vmax.f32 %v418_v46, 0.0  ;;  %v2303_v46 = vld [vmem:[%s3324_s8 + $0x120] sm:$0xff] }
 0x16e   :  { %v420_v14 = vpop.f32.mrf.mxu0 }
 0x16f   :  { %v421_v43 = vadd.f32 %v2084_v19, %v420_v14  ;;  %v712_v14 = vld [vmem:[%s3323_s7 + $0x10] sm:$0xff] }
 0x171   :  { %v554_v52 = vmax.f32 %v421_v43, 0.0  ;;  %v2288_v43 = vld [vmem:[%s3324_s8 + $0x160] sm:$0xff] }
 0x176   :  { %v423_v36 = vpop.f32.mrf.mxu0 }
 0x177   :  { %v424_v41 = vadd.f32 %v2084_v19, %v423_v36  ;;  %v2263_v36 = vld [vmem:[%s3324_s8 + $0x1e0] sm:$0xff] }
 0x179   :  { %v555_v47 = vmax.f32 %v424_v41, 0.0  ;;  %v2276_v41 = vld [vmem:[%s3324_s8 + $0x1a0] sm:$0xff] }
 0x17e   :  { %v426_v38 = vpop.f32.mrf.mxu0 }
 0x17f   :  { %v427_v10 = vadd.f32 %v2084_v19, %v426_v38  ;;  %v2270_v38 = vld [vmem:[%s3324_s8 + $0x1c0] sm:$0xff] }
 0x181   :  { %v556_v44 = vmax.f32 %v427_v10, 0.0  ;;  %v2282_v10 = vld [vmem:[%s3324_s8 + $0x180] sm:$0xff] }
 0x183   :  { %620 = vmatpush.msrb.mxu2 %v556_v44  ;;  %v2294_v44 = vld [vmem:[%s3324_s8 + $0x140] sm:$0xff] }
 0x185   :  { %621 = vmatpush.msrb.mxu2 %v555_v47  ;;  %v2308_v47 = vld [vmem:[%s3324_s8 + $0x100] sm:$0xff] }
 0x186   :  { %v429_v55 = vpop.f32.mrf.mxu0 }
 0x187   :  { %622 = vmatpush.msrb.mxu2 %v554_v52  ;;  %v430_v23 = vadd.f32 %v2084_v19, %v429_v55  ;;  %v2321_v52 = vld [vmem:[%s3324_s8 + $0xc0] sm:$0xff] }
 0x188   :  { %v2327_v55 = vld [vmem:[%s3324_s8 + $0xa0] sm:$0xff] }
 0x189   :  { %623 = vmatpush.msrb.mxu2 %v553_v57  ;;  %v557_v33 = vmax.f32 %v430_v23, 0.0  ;;  %v2339_v57 = vld [vmem:[%s3324_s8 + $0x60] sm:$0xff]  ;;  %v2557_v23 = vld [vmem:[%s3324_s8 + $0x38] sm:$0xff] }
 0x18a   :  { %3409 = vst [vmem:[#allocation20_spill] sm:$0xff] %v2557_v23 }
 0x18b   :  { %624 = vmatpush.msrb.mxu2 %v552_v42  ;;  %v2351_v42 = vld [vmem:[%s3324_s8 + $0x1f0] sm:$0xff] }
 0x18c   :  { %920 = vmatpush.msrb.mxu1 %v2351_v42 }
 0x18d   :  { %625 = vmatpush.msrb.mxu2 %v551_v62  ;;  %v2363_v62 = vld [vmem:[%s3324_s8 + $0x1d0] sm:$0xff] }
 0x18e   :  { %v432_v24 = vpop.f32.mrf.mxu0  ;;  %921 = vmatpush.msrb.mxu1 %v2363_v62 }
 0x18f   :  { %626 = vmatpush.msrb.mxu2 %v550_v63  ;;  %v433_v30 = vadd.f32 %v2084_v19, %v432_v24  ;;  %v3332_v63 = vmov 0.0   ;;  %v2376_v24 = vld [vmem:[%s3324_s8 + $0x1b0] sm:$0xff] }
 0x190   :  { %922 = vmatpush.msrb.mxu1 %v2376_v24 }
 0x191   :  { %627 = vmatpush.msrb.mxu2 %v549_v58  ;;  %v558_v26 = vmax.f32 %v433_v30, 0.0  ;;  %v2388_v58 = vld [vmem:[%s3324_s8 + $0x170] sm:$0xff]  ;;  %v2551_v30 = vld [vmem:[%s3324_s8 + $0x58] sm:$0xff] }
 0x192   :  { %923 = vmatpush.msrb.mxu1 %v2382_v0  ;;  %3408 = vst [vmem:[#allocation19_spill] sm:$0xff] %v2551_v30 }
 0x193   :  { %628 = vmatpush.msrb.mxu2 %v548_v4  ;;  %v2406_v4 = vld [vmem:[%s3324_s8 + $0x110] sm:$0xff] }
 0x194   :  { %924 = vmatpush.msrb.mxu1 %v2388_v58 }
 0x195   :  { %629 = vmatpush.msrb.mxu2 %v547_v32  ;;  %v2417_v32 = vld [vmem:[%s3324_s8 + $0xf0] sm:$0xff] }
 0x196   :  { %v435_v6 = vpop.f32.mrf.mxu0  ;;  %925 = vmatpush.msrb.mxu1 %v2394_v2  ;;  %3394 = vst [vmem:[#allocation5_spill] sm:$0xff] %v2417_v32 }
 0x197   :  { %630 = vmatpush.msrb.mxu2 %v546_v5  ;;  %v436_v9 = vadd.f32 %v2084_v19, %v435_v6  ;;  %v2429_v5 = vld [vmem:[%s3324_s8 + $0xd0] sm:$0xff]  ;;  %v2436_v6 = vld [vmem:[%s3324_s8 + $0x1b8] sm:$0xff] }
 0x198   :  { %926 = vmatpush.msrb.mxu1 %v2400_v48  ;;  %3395 = vst [vmem:[#allocation6_spill] sm:$0xff] %v2429_v5 }
 0x199   :  { %631 = vmatpush.msrb.mxu2 %v545_v7  ;;  %v559_v25 = vmax.f32 %v436_v9, 0.0  ;;  %v2448_v7 = vld [vmem:[%s3324_s8 + $0x198] sm:$0xff] }
 0x19a   :  { %927 = vmatpush.msrb.mxu1 %v2406_v4  ;;  %v2539_v9 = vld [vmem:[%s3324_s8 + $0x98] sm:$0xff] }
 0x19b   :  { %632 = vmatpush.msrb.mxu2 %v544_v17  ;;  %v680_v17 = vld [vmem:[%s3320_s4] sm:$0xff]  ;;  %3406 = vst [vmem:[#allocation17_spill] sm:$0xff] %v2539_v9 }
 0x19c   :  { %928 = vmatpush.msrb.mxu1 %v2417_v32  ;;  %v2895_v32 = vld [vmem:[%s3326_s10 + $0x98] sm:$0xff] }
 0x19d   :  { %633 = vmatpush.msrb.mxu2 %v543_v8  ;;  %v2466_v8 = vld [vmem:[%s3324_s8 + $0x178] sm:$0xff]  ;;  %3442 = vst [vmem:[#allocation52_spill] sm:$0xff] %v2895_v32 }
 0x19e   :  { %v438_v15 = vpop.f32.mrf.mxu0  ;;  %929 = vmatpush.msrb.mxu1 %v2429_v5 }
 0x19f   :  { %634 = vmatpush.msrb.mxu2 %v542_v11  ;;  %v439_v20 = vadd.f32 %v2084_v19, %v438_v15  ;;  %v2471_v11 = vld [vmem:[%s3324_s8 + $0x70] sm:$0xff]  ;;  %v2481_v15 = vld [vmem:[%s3324_s8 + $0x158] sm:$0xff] }
 0x1a0   :  { %930 = vmatpush.msrb.mxu1 %v2441_v45  ;;  %3398 = vst [vmem:[#allocation9_spill] sm:$0xff] %v2471_v11  ;;  %v2779_v45 = vld [vmem:[%s3326_s10 + $0x168] sm:$0xff] }
 0x1a1   :  { %635 = vmatpush.msrb.mxu2 %v541_v16  ;;  %v560_v49 = vmax.f32 %v439_v20, 0.0  ;;  %v2486_v16 = vld [vmem:[%s3324_s8 + $0x50] sm:$0xff]  ;;  %v2527_v20 = vld [vmem:[%s3324_s8 + $0xd8] sm:$0xff]  ;;  %3423 = vst [vmem:[#allocation33_spill] sm:$0xff] %v2779_v45 }
 0x1a2   :  { %636 = vmatmul.f32.vlgmr.msrb.gmra.mxu2 %v593_v3  ;;  %931 = vmatpush.msrb.mxu1 %v2453_v39  ;;  %3399 = vst [vmem:[#allocation10_spill] sm:$0xff] %v2486_v16  ;;  %v711_v3 = vld [vmem:[%s3323_s7 + $0x8] sm:$0xff]  ;;  %v2761_v39 = vld [vmem:[%s3326_s10 + $0x170] sm:$0xff] }
 0x1a3   :  { %704 = vmatpush.msra.mxu2 %v680_v17  ;;  %3404 = vst [vmem:[#allocation15_spill] sm:$0xff] %v2527_v20  ;;  %v2579_v17 = vld [vmem:[%s3324_s8 + $0x1e8] sm:$0xff] }
 0x1a4   :  { %932 = vmatpush.msrb.mxu1 %v2471_v11  ;;  %v2739_v11 = vld [vmem:[%s3326_s10 + $0xd8] sm:$0xff]  ;;  %3420 = vst [vmem:[#allocation30_spill] sm:$0xff] %v2761_v39 }
 0x1a5   :  { %769 = vmatpush.msrb.mxu2 %v719_v22  ;;  %v2586_v22 = vld [vmem:[%s3324_s8 + $0x1c8] sm:$0xff]  ;;  %3416 = vst [vmem:[#allocation26_spill] sm:$0xff] %v2739_v11 }
 0x1a6   :  { %v441_v35 = vpop.f32.mrf.mxu0  ;;  %933 = vmatpush.msrb.mxu1 %v2486_v16  ;;  %v2713_v16 = vld [vmem:[%s3326_s10 + $0xe8] sm:$0xff] }
 0x1a7   :  { %v442_v12 = vadd.f32 %v2084_v19, %v441_v35  ;;  %770 = vmatpush.msrb.mxu2 %v715_v40  ;;  %v2501_v35 = vld [vmem:[%s3324_s8 + $0x30] sm:$0xff]  ;;  %v2592_v40 = vld [vmem:[%s3324_s8 + $0x1a8] sm:$0xff]  ;;  %3414 = vst [vmem:[#allocation24_spill] sm:$0xff] %v2713_v16 }
 0x1a8   :  { %3400 = vst [vmem:[#allocation11_spill] sm:$0xff] %v2501_v35  ;;  %934 = vmatpush.msrb.mxu1 %v2501_v35  ;;  %v2703_v35 = vld [vmem:[%s3326_s10 + $0xf0] sm:$0xff] }
 0x1a9   :  { %v561_v1 = vmax.f32 %v442_v12, 0.0  ;;  %771 = vmatpush.msrb.mxu2 %v711_v3  ;;  %v2513_v12 = vld [vmem:[%s3324_s8 + $0x10] sm:$0xff]  ;;  %v2598_v3 = vld [vmem:[%s3324_s8 + $0x188] sm:$0xff]  ;;  %3413 = vst [vmem:[#allocation23_spill] sm:$0xff] %v2703_v35 }
 0x1aa   :  { %3402 = vst [vmem:[#allocation13_spill] sm:$0xff] %v2513_v12  ;;  %935 = vmatpush.msrb.mxu1 %v2513_v12  ;;  %v2686_v12 = vld [vmem:[%s3326_s10 + $0x70] sm:$0xff] }
 0x1ab   :  { %936 = vmatmul.f32.vlgmr.msrb.gmra.mxu1 %v3332_v63 }
 0x1ae   :  { %v444_v53 = vpop.f32.mrf.mxu0 }
 0x1af   :  { %v445_v37 = vadd.f32 %v2084_v19, %v444_v53  ;;  %v710_v19 = vld [vmem:[%s3323_s7] sm:$0xff]  ;;  %v2508_v53 = vld [vmem:[%s3324_s8 + $0x118] sm:$0xff] }
 0x1b0   :  { %3401 = vst [vmem:[#allocation12_spill] sm:$0xff] %v2508_v53 }
 0x1b1   :  { %v562_v21 = vmax.f32 %v445_v37, 0.0  ;;  %v2520_v37 = vld [vmem:[%s3324_s8 + $0xf8] sm:$0xff] }
 0x1b2   :  { %3403 = vst [vmem:[#allocation14_spill] sm:$0xff] %v2520_v37 }
 0x1b3   :  { %650 = vmatpush.msrb.mxu3 %v562_v21  ;;  %v2533_v21 = vld [vmem:[%s3324_s8 + $0xb8] sm:$0xff] }
 0x1b4   :  { %3405 = vst [vmem:[#allocation16_spill] sm:$0xff] %v2533_v21 }
 0x1b5   :  { %651 = vmatpush.msrb.mxu3 %v561_v1  ;;  %v2545_v1 = vld [vmem:[%s3324_s8 + $0x78] sm:$0xff] }
 0x1b6   :  { %3407 = vst [vmem:[#allocation18_spill] sm:$0xff] %v2545_v1 }
 0x1b7   :  { %652 = vmatpush.msrb.mxu3 %v560_v49  ;;  %v617_v49 = vpop.f32.mrf.mxu1 }
 0x1b9   :  { %653 = vmatpush.msrb.mxu3 %v559_v25  ;;  %v2563_v25 = vld [vmem:[%s3324_s8 + $0x18] sm:$0xff] }
 0x1ba   :  { %3410 = vst [vmem:[#allocation21_spill] sm:$0xff] %v2563_v25 }
 0x1bb   :  { %654 = vmatpush.msrb.mxu3 %v558_v26 }
 0x1bd   :  { %655 = vmatpush.msrb.mxu3 %v557_v33 }
 0x1be   :  { %656 = vmatmul.f32.vlgmr.msrb.gmra.mxu3 %v594_v27 }
 0x1bf   :  { %749 = vmatpush.msra.mxu3 %v718_v28  ;;  %v677_v28 = vpop.f32.mrf.mxu1 }
 0x1c1   :  { %750 = vmatpush.msra.mxu3 %v714_v18 }
 0x1c3   :  { %751 = vmatpush.msra.mxu3 %v710_v19 }
 0x1c5   :  { %789 = vmatpush.msrb.mxu3 %v720_v29  ;;  %v721_v29 = vld [vmem:[%s3323_s7 + $0x58] sm:$0xff] }
 0x1c6   :  { %1596 = vmatmul.msk.f32.vlgmr.msra.gmra.mxu3 %vm732_vm1, %v2255_v34 }
 0x1c7   :  { %790 = vmatpush.msrb.mxu3 %v716_v31  ;;  %v717_v31 = vld [vmem:[%s3323_s7 + $0x38] sm:$0xff] }
 0x1c9   :  { %791 = vmatpush.msrb.mxu3 %v712_v14  ;;  %v713_v14 = vld [vmem:[%s3323_s7 + $0x18] sm:$0xff] }
 0x1cb   :  { %880 = vmatpush.msra.mxu3 %v2263_v36 }
 0x1cd   :  { %881 = vmatpush.msra.mxu3 %v2270_v38 }
 0x1ce   :  { %1598 = vmatmul.msk.f32.vlgmr.msrb.gmra.mxu3 %vm732_vm1, %v2255_v34 }
 0x1cf   :  { %882 = vmatpush.msra.mxu3 %v2276_v41 }
 0x1d1   :  { %883 = vmatpush.msra.mxu3 %v2282_v10 }
 0x1d3   :  { %884 = vmatpush.msra.mxu3 %v2288_v43 }
 0x1d5   :  { %885 = vmatpush.msra.mxu3 %v2294_v44 }
 0x1d7   :  { %886 = vmatpush.msra.mxu3 %v2303_v46 }
 0x1d9   :  { %887 = vmatpush.msra.mxu3 %v2308_v47 }
 0x1db   :  { %888 = vmatpush.msra.mxu3 %v2315_v51 }
 0x1dd   :  { %889 = vmatpush.msra.mxu3 %v2321_v52 }
 0x1df   :  { %890 = vmatpush.msra.mxu3 %v2327_v55 }
 0x1e1   :  { %891 = vmatpush.msra.mxu3 %v2333_v56 }
 0x1e3   :  { %892 = vmatpush.msra.mxu3 %v2339_v57 }
 0x1e5   :  { %893 = vmatpush.msra.mxu3 %v2345_v61 }
 0x1e7   :  { %894 = vmatpush.msra.mxu3 %v2357_v60 }
 0x1e9   :  { %895 = vmatpush.msra.mxu3 %v2369_v59 }
 0x1ea   :  { %896 = vmatmul.f32.vlgmr.msra.gmra.mxu3 %v3332_v63 }
 0x1eb   :  { %940 = vmatpush.msrb.mxu3 %v2412_v50 }
 0x1ed   :  { %941 = vmatpush.msrb.mxu3 %v2424_v54 }
 0x1ef   :  { %942 = vmatpush.msrb.mxu3 %v2436_v6 }
 0x1f1   :  { %943 = vmatpush.msrb.mxu3 %v2448_v7 }
 0x1f3   :  { %944 = vmatpush.msrb.mxu3 %v2466_v8 }
 0x1f5   :  { %945 = vmatpush.msrb.mxu3 %v2481_v15 }
 0x1f7   :  { %946 = vmatpush.msrb.mxu3 %v2496_v13 }
 0x1f9   :  { %947 = vmatpush.msrb.mxu3 %v2508_v53  ;;  %v2862_v53 = vld [vmem:[%s3326_s10 + $0x148] sm:$0xff] }
 0x1fa   :  { %3436 = vst [vmem:[#allocation46_spill] sm:$0xff] %v2862_v53 }
 0x1fb   :  { %948 = vmatpush.msrb.mxu3 %v2520_v37  ;;  %v2790_v37 = vld [vmem:[%s3326_s10 + $0xc0] sm:$0xff] }
 0x1fc   :  { %3425 = vst [vmem:[#allocation35_spill] sm:$0xff] %v2790_v37 }
 0x1fd   :  { %949 = vmatpush.msrb.mxu3 %v2527_v20  ;;  %v2772_v20 = vld [vmem:[%s3326_s10 + $0xc8] sm:$0xff] }
 0x1fe   :  { %3422 = vst [vmem:[#allocation32_spill] sm:$0xff] %v2772_v20 }
 0x1ff   :  { %950 = vmatpush.msrb.mxu3 %v2533_v21  ;;  %v2744_v21 = vld [vmem:[%s3326_s10 + $0x178] sm:$0xff] }
 0x200   :  { %3417 = vst [vmem:[#allocation27_spill] sm:$0xff] %v2744_v21 }
 0x201   :  { %951 = vmatpush.msrb.mxu3 %v2539_v9  ;;  %v2725_v9 = vld [vmem:[%s3326_s10 + $0xe0] sm:$0xff] }
 0x202   :  { %3415 = vst [vmem:[#allocation25_spill] sm:$0xff] %v2725_v9 }
 0x203   :  { %952 = vmatpush.msrb.mxu3 %v2545_v1  ;;  %v2708_v1 = vld [vmem:[%s3326_s10 + $0x60] sm:$0xff] }
 0x205   :  { %953 = vmatpush.msrb.mxu3 %v2551_v30  ;;  %v2691_v30 = vld [vmem:[%s3326_s10 + $0xf8] sm:$0xff] }
 0x206   :  { %3412 = vst [vmem:[#allocation22_spill] sm:$0xff] %v2691_v30  ;;  %1085 = vmatpush.msra.mxu1 %v2691_v30  ;;  %v2720_v30 = vld [vmem:[%s3326_s10 + $0x58] sm:$0xff] }
 0x207   :  { %954 = vmatpush.msrb.mxu3 %v2557_v23  ;;  %v2680_v23 = vld [vmem:[%s3326_s10 + $0x78] sm:$0xff] }
 0x208   :  { %1086 = vmatpush.msra.mxu1 %v2703_v35  ;;  %v2734_v35 = vld [vmem:[%s3326_s10 + $0x50] sm:$0xff] }
 0x209   :  { %955 = vmatpush.msrb.mxu3 %v2563_v25  ;;  %v3411_v25 = vmov 0.0  }
 0x20a   :  { %956 = vmatmul.f32.vlgmr.msrb.gmra.mxu3 %v3332_v63  ;;  %v2672_v63 = vld [vmem:[%s3324_s8 + $0x8] sm:$0xff]  ;;  %1087 = vmatpush.msra.mxu1 %v2713_v16  ;;  %v2756_v16 = vld [vmem:[%s3326_s10 + $0xd0] sm:$0xff] }
 0x20b   :  { %3419 = vst [vmem:[#allocation29_spill] sm:$0xff] %v2756_v16  ;;  %1125 = vmatpush.msra.mxu3 %v2744_v21  ;;  %v2785_v21 = vld [vmem:[%s3326_s10 + $0x38] sm:$0xff] }
 0x20c   :  { %1088 = vmatpush.msra.mxu1 %v2725_v9  ;;  %v2751_v9 = vld [vmem:[%s3326_s10 + $0x48] sm:$0xff]  ;;  %3424 = vst [vmem:[#allocation34_spill] sm:$0xff] %v2785_v21 }
 0x20d   :  { %3418 = vst [vmem:[#allocation28_spill] sm:$0xff] %v2751_v9  ;;  %1126 = vmatpush.msra.mxu3 %v2761_v39 }
 0x20e   :  { %1089 = vmatpush.msra.mxu1 %v2739_v11  ;;  %v2767_v11 = vld [vmem:[%s3326_s10 + $0x40] sm:$0xff] }
 0x20f   :  { %3421 = vst [vmem:[#allocation31_spill] sm:$0xff] %v2767_v11  ;;  %1127 = vmatpush.msra.mxu3 %v2779_v45  ;;  %v2815_v45 = vld [vmem:[%s3326_s10 + $0x30] sm:$0xff] }
 0x210   :  { %1090 = vmatpush.msra.mxu1 %v2756_v16  ;;  %v2797_v16 = vld [vmem:[%s3326_s10 + $0x160] sm:$0xff]  ;;  %3428 = vst [vmem:[#allocation38_spill] sm:$0xff] %v2815_v45 }
 0x211   :  { %3426 = vst [vmem:[#allocation36_spill] sm:$0xff] %v2797_v16  ;;  %1128 = vmatpush.msra.mxu3 %v2797_v16  ;;  %v2825_v16 = vld [vmem:[%s3326_s10 + $0x158] sm:$0xff] }
 0x212   :  { %1091 = vmatpush.msra.mxu1 %v2772_v20  ;;  %v2808_v20 = vld [vmem:[%s3325_s9] sm:$0xf]  ;;  %3430 = vst [vmem:[#allocation40_spill] sm:$0xff] %v2825_v16 }
 0x213   :  { %1129 = vmatpush.msra.mxu3 %v2825_v16  ;;  %v2857_v16 = vld [vmem:[%s3326_s10 + $0xa8] sm:$0xff] }
 0x214   :  { %1092 = vmatpush.msra.mxu1 %v2790_v37  ;;  %v2820_v37 = vld [vmem:[%s3326_s10 + $0xb8] sm:$0xff]  ;;  %3435 = vst [vmem:[#allocation45_spill] sm:$0xff] %v2857_v16 }
 0x215   :  { %3429 = vst [vmem:[#allocation39_spill] sm:$0xff] %v2820_v37 }
 0x216   :  { %1093 = vmatpush.msra.mxu1 %v2820_v37  ;;  %v2852_v37 = vld [vmem:[%s3326_s10 + $0x20] sm:$0xff] }
 0x217   :  { %3434 = vst [vmem:[#allocation44_spill] sm:$0xff] %v2852_v37 }
 0x225   :  { %v637_v26 = vpop.f32.mrf.mxu2 }
 0x226   :  { %v638_v33 = vadd.f32 %v637_v26, %v617_v49  ;;  %v2604_v49 = vld [vmem:[%s3324_s8 + $0x168] sm:$0xff] }
 0x227   :  { %v2610_v26 = vld [vmem:[%s3324_s8 + $0x148] sm:$0xff] }
 0x241   :  { %v657_v27 = vpop.f32.mrf.mxu3 }
 0x242   :  { %v658_v18 = vadd.f32 %v657_v27, %v638_v33  ;;  %v2618_v33 = vld [vmem:[%s3324_s8 + $0x128] sm:$0xff] }
 0x243   :  { %v2624_v27 = vld [vmem:[%s3324_s8 + $0x108] sm:$0xff] }
 0x244   :  { %v678_v19 = vadd.f32 %v677_v28, %v658_v18  ;;  %v2636_v28 = vld [vmem:[%s3324_s8 + $0xc8] sm:$0xff] }
 0x245   :  { %v2642_v18 = vld [vmem:[%s3324_s8 + $0xa8] sm:$0xff] }
 0x246   :  { %1595 = vmatmul.msk.f32.vlgmr.msra.gmra.mxu2 %vm685_vm2, %v678_v19  ;;  %v2648_v19 = vld [vmem:[%s3324_s8 + $0x88] sm:$0xff] }
 0x247   :  { %809 = vmatpush.msra.mxu2 %v721_v29  ;;  %v2654_v29 = vld [vmem:[%s3324_s8 + $0x68] sm:$0xff] }
 0x249   :  { %810 = vmatpush.msra.mxu2 %v717_v31  ;;  %v2660_v31 = vld [vmem:[%s3324_s8 + $0x48] sm:$0xff]  ;;  %v753_v39 = vpop.f32.mrf.mxu3 }
 0x24b   :  { %811 = vmatpush.msra.mxu2 %v713_v14  ;;  %v2666_v14 = vld [vmem:[%s3324_s8 + $0x28] sm:$0xff] }
 0x24e   :  { %1597 = vmatmul.msk.f32.vlgmr.msrb.gmra.mxu2 %vm732_vm1, %v2255_v34 }
 0x24f   :  { %900 = vmatpush.msrb.mxu2 %v2579_v17 }
 0x251   :  { %901 = vmatpush.msrb.mxu2 %v2586_v22  ;;  %v2803_v5 = vpop.f32.mrf.mxu3 }
 0x253   :  { %902 = vmatpush.msrb.mxu2 %v2592_v40 }
 0x255   :  { %903 = vmatpush.msrb.mxu2 %v2598_v3 }
 0x256   :  { %1599 = vmatmul.msk.f32.vlgmr.msra.gmra.mxu2 %vm732_vm1, %v2255_v34  ;;  %v2630_v34 = vld [vmem:[%s3324_s8 + $0xe8] sm:$0xff] }
 0x257   :  { %904 = vmatpush.msrb.mxu2 %v2604_v49 }
 0x259   :  { %905 = vmatpush.msrb.mxu2 %v2610_v26 }
 0x25b   :  { %906 = vmatpush.msrb.mxu2 %v2618_v33 }
 0x25d   :  { %907 = vmatpush.msrb.mxu2 %v2624_v27 }
 0x25f   :  { %908 = vmatpush.msrb.mxu2 %v2630_v34 }
 0x261   :  { %909 = vmatpush.msrb.mxu2 %v2636_v28 }
 0x263   :  { %910 = vmatpush.msrb.mxu2 %v2642_v18 }
 0x265   :  { %911 = vmatpush.msrb.mxu2 %v2648_v19 }
 0x267   :  { %912 = vmatpush.msrb.mxu2 %v2654_v29 }
 0x269   :  { %913 = vmatpush.msrb.mxu2 %v2660_v31 }
 0x26b   :  { %914 = vmatpush.msrb.mxu2 %v2666_v14 }
 0x26d   :  { %915 = vmatpush.msrb.mxu2 %v2672_v63 }
 0x26e   :  { %916 = vmatmul.f32.vlgmr.msrb.gmra.mxu2 %v3411_v25  ;;  %v2696_v25 = vld [vmem:[%s3326_s10 + $0x68] sm:$0xff] }
 0x26f   :  { %1044 = vmatpush.msra.mxu2 %v2680_v23 }
 0x271   :  { %1045 = vmatpush.msra.mxu2 %v2686_v12 }
 0x273   :  { %1046 = vmatpush.msra.mxu2 %v2696_v25 }
 0x275   :  { %1047 = vmatpush.msra.mxu2 %v2708_v1 }
 0x277   :  { %1048 = vmatpush.msra.mxu2 %v2720_v30 }
 0x279   :  { %1049 = vmatpush.msra.mxu2 %v2734_v35 }
 0x27b   :  { %1050 = vmatpush.msra.mxu2 %v2751_v9  ;;  %v2843_v9 = vld [vmem:[%s3326_s10 + $0x150] sm:$0xff] }
 0x27c   :  { %3433 = vst [vmem:[#allocation43_spill] sm:$0xff] %v2843_v9  ;;  %1130 = vmatpush.msra.mxu3 %v2843_v9  ;;  %v2875_v9 = vld [vmem:[%s3326_s10 + $0xa0] sm:$0xff] }
 0x27d   :  { %1051 = vmatpush.msra.mxu2 %v2767_v11  ;;  %3438 = vst [vmem:[#allocation48_spill] sm:$0xff] %v2875_v9 }
 0x27e   :  { %1131 = vmatpush.msra.mxu3 %v2862_v53  ;;  %v2890_v53 = vld [vmem:[%s3326_s10 + $0x10] sm:$0xff] }
 0x27f   :  { %1052 = vmatpush.msra.mxu2 %v2785_v21  ;;  %v2838_v21 = vld [vmem:[%s3326_s10 + $0xb0] sm:$0xff]  ;;  %3441 = vst [vmem:[#allocation51_spill] sm:$0xff] %v2890_v53 }
 0x280   :  { %3432 = vst [vmem:[#allocation42_spill] sm:$0xff] %v2838_v21  ;;  %1094 = vmatpush.msra.mxu1 %v2838_v21  ;;  %v2870_v21 = vld [vmem:[%s3326_s10 + $0x18] sm:$0xff] }
 0x281   :  { %1053 = vmatpush.msra.mxu2 %v2815_v45  ;;  %v724_v45 = vperm.slane %v2808_v20, 0  ;;  %3437 = vst [vmem:[#allocation47_spill] sm:$0xff] %v2870_v21 }
 0x282   :  { %1095 = vmatpush.msra.mxu1 %v2857_v16  ;;  %v897_v16 = vpop.f32.mrf.mxu3 }
 0x284   :  { %1096 = vmatpush.msra.mxu1 %v2875_v9  ;;  %v2910_v9 = vld [vmem:[%s3326_s10 + $0x8] sm:$0xff] }
 0x286   :  { %1097 = vmatpush.msra.mxu1 %v2895_v32 }
 0x2c9   :  { %v2810_v11 = vpop.f32.mrf.mxu2 }
 0x2ca   :  { %3427 = vst [vmem:[#allocation37_spill] sm:$0xff] %v2810_v11  ;;  %v2833_v11 = vld [vmem:[%s3326_s10 + $0x28] sm:$0xff] }
 0x2cb   :  { %3431 = vst [vmem:[#allocation41_spill] sm:$0xff] %v2833_v11  ;;  %1054 = vmatpush.msra.mxu2 %v2833_v11  ;;  %v2880_v11 = vld [vmem:[%s3326_s10 + $0x140] sm:$0xff] }
 0x2cc   :  { %3439 = vst [vmem:[#allocation49_spill] sm:$0xff] %v2880_v11  ;;  %1132 = vmatpush.msra.mxu3 %v2880_v11  ;;  %v2915_v11 = vld [vmem:[%s3326_s10 + $0x90] sm:$0xff] }
 0x2cd   :  { %1055 = vmatpush.msra.mxu2 %v2852_v37  ;;  %v2882_v37 = vadd.f32 %v753_v39, %v724_v45  ;;  %v2900_v45 = vld [vmem:[%s3326_s10 + $0x138] sm:$0xff]  ;;  %3444 = vst [vmem:[#allocation54_spill] sm:$0xff] %v2915_v11  ;;  %1098 = vmatpush.msra.mxu1 %v2915_v11  ;;  %v2953_v11 = vld [vmem:[%s3326_s10 + $0x80] sm:$0xff] }
 0x2ce   :  { %3443 = vst [vmem:[#allocation53_spill] sm:$0xff] %v2900_v45  ;;  %1133 = vmatpush.msra.mxu3 %v2900_v45  ;;  %v2929_v45 = vld [vmem:[%s3326_s10] sm:$0xff] }
 0x2cf   :  { %3440 = vst [vmem:[#allocation50_spill] sm:$0xff] %v2882_v37  ;;  %1056 = vmatpush.msra.mxu2 %v2870_v21  ;;  %v960_v32 = vadd.f32 %v897_v16, %v2882_v37  ;;  %v2934_v21 = vld [vmem:[%s3326_s10 + $0x88] sm:$0xff]  ;;  %v2946_v37 = vld [vmem:[%s3326_s10 + $0x1f8] sm:$0xff] }
 0x2d0   :  { %3446 = vst [vmem:[#allocation56_spill] sm:$0xff] %v2929_v45  ;;  %v2939_v16 = vld [vmem:[%s3326_s10 + $0x128] sm:$0xff]  ;;  %1099 = vmatpush.msra.mxu1 %v2934_v21 }
 0x2d1   :  { %1057 = vmatpush.msra.mxu2 %v2890_v53  ;;  %v2904_v39 = vpop.f32.mrf.mxu2  ;;  %v2920_v53 = vld [vmem:[%s3326_s10 + $0x130] sm:$0xff]  ;;  %3447 = vst [vmem:[#allocation57_spill] sm:$0xff] %v2934_v21  ;;  %v1600_v21 = vmul.f32 -1.442695, %v960_v32  ;;  %v2978_v32 = vld [vmem:[%s3326_s10 + $0x1e8] sm:$0xff] }
 0x2d2   :  { %3445 = vst [vmem:[#allocation55_spill] sm:$0xff] %v2920_v53  ;;  %1134 = vmatpush.msra.mxu3 %v2920_v53  ;;  %v2958_v53 = vld [vmem:[%s3326_s10 + $0x120] sm:$0xff]  ;;  %1100 = vmatpush.msra.mxu1 %v2953_v11 }
 0x2d3   :  { %1058 = vmatpush.msra.mxu2 %v2910_v9  ;;  %3448 = vst [vmem:[#allocation58_spill] sm:$0xff] %v2939_v16  ;;  %1673 = vpow2.f32 %v1600_v21  ;;  %v957_v21 = vpop.f32.mrf.mxu3 }
 0x2d4   :  { %3449 = vst [vmem:[#allocation59_spill] sm:$0xff] %v2946_v37  ;;  %1135 = vmatpush.msra.mxu3 %v2939_v16  ;;  %v2971_v16 = vld [vmem:[%s3326_s10 + $0x118] sm:$0xff]  ;;  %1186 = vmatpush.msrb.mxu1 %v2263_v36  ;;  %v2991_v36 = vld [vmem:[%s3326_s10 + $0x1e0] sm:$0xff] }
 0x2d5   :  { %1059 = vmatpush.msra.mxu2 %v2929_v45  ;;  %3450 = vst [vmem:[#allocation60_spill] sm:$0xff] %v2953_v11  ;;  %v2964_v45 = vld [vmem:[%s3326_s10 + $0x1f0] sm:$0xff] }
 0x2d6   :  { %3451 = vst [vmem:[#allocation61_spill] sm:$0xff] %v2958_v53  ;;  %1136 = vmatpush.msra.mxu3 %v2958_v53  ;;  %v2985_v53 = vld [vmem:[%s3326_s10 + $0x110] sm:$0xff]  ;;  %1187 = vmatpush.msrb.mxu1 %v2270_v38  ;;  %v3006_v38 = vld [vmem:[%s3326_s10 + $0x1d8] sm:$0xff] }
 0x2d7   :  { %1165 = vmatpush.msrb.mxu2 %v2946_v37  ;;  %3452 = vst [vmem:[#allocation62_spill] sm:$0xff] %v2971_v16  ;;  %v727_v37 = vperm.slane %v2808_v20, 3 }
 0x2d8   :  { %3453 = vst [vmem:[#allocation63_spill] sm:$0xff] %v2978_v32  ;;  %1137 = vmatpush.msra.mxu3 %v2971_v16  ;;  %v2998_v16 = vld [vmem:[%s3326_s10 + $0x108] sm:$0xff]  ;;  %1188 = vmatpush.msrb.mxu1 %v2276_v41  ;;  %v3019_v41 = vld [vmem:[%s3326_s10 + $0x1d0] sm:$0xff] }
 0x2d9   :  { %1166 = vmatpush.msrb.mxu2 %v2964_v45  ;;  %v813_v11 = vpop.f32.mrf.mxu2  ;;  %3454 = vst [vmem:[#allocation64_spill] sm:$0xff] %v2985_v53 }
 0x2da   :  { %1138 = vmatpush.msra.mxu3 %v2985_v53  ;;  %v3013_v53 = vld [vmem:[%s3326_s10 + $0x100] sm:$0xff]  ;;  %1189 = vmatpush.msrb.mxu1 %v2282_v10  ;;  %v3029_v10 = vld [vmem:[%s3326_s10 + $0x1c8] sm:$0xff] }
 0x2db   :  { %1167 = vmatpush.msrb.mxu2 %v2978_v32  ;;  %v3000_v32 = vadd.f32 %v813_v11, %v727_v37  ;;  %3455 = vst [vmem:[#allocation65_spill] sm:$0xff] %v3013_v53  ;;  %v1674_v11 = vpop.eup %1673 }
 0x2dc   :  { %1139 = vmatpush.msra.mxu3 %v2998_v16  ;;  %1190 = vmatpush.msrb.mxu1 %v2288_v43  ;;  %v725_v43 = vperm.slane %v2808_v20, 1 }
 0x2dd   :  { %1168 = vmatpush.msrb.mxu2 %v2991_v36  ;;  %v963_v37 = vadd.f32 %v957_v21, %v3000_v32  ;;  %v3039_v21 = vadd.f32 1.0, %v1674_v11  ;;  %v3102_v11 = vld [vmem:[%s3326_s10 + $0x188] sm:$0xff] }
 0x2de   :  { %1140 = vmatpush.msra.mxu3 %v3013_v53  ;;  %1191 = vmatpush.msrb.mxu1 %v2294_v44  ;;  %v3037_v53 = vld [vmem:[%s3326_s10 + $0x1c0] sm:$0xff]  ;;  %v3048_v44 = vld [vmem:[%s3326_s10 + $0x1b8] sm:$0xff] }
 0x2df   :  { %1169 = vmatpush.msrb.mxu2 %v3006_v38  ;;  %1675 = vrcp.f32 %v3039_v21  ;;  %vm973_vm3 = vweird.f32 %v3039_v21 }
 0x2e0   :  { %1206 = vmatpush.msrb.mxu3 %v2579_v17  ;;  %v1602_v17 = vmul.f32 -1.442695, %v963_v37  ;;  %1192 = vmatpush.msrb.mxu1 %v2303_v46  ;;  %v3060_v46 = vadd.f32 %v2904_v39, %v725_v43  ;;  %v3077_v39 = vld [vmem:[%s3326_s10 + $0x1a0] sm:$0xff] }
 0x2e1   :  { %1170 = vmatpush.msrb.mxu2 %v3019_v41 }
 0x2e2   :  { %1207 = vmatpush.msrb.mxu3 %v2586_v22  ;;  %1193 = vmatpush.msrb.mxu1 %v2308_v47  ;;  %v3056_v22 = vld [vmem:[%s3326_s10 + $0x1b0] sm:$0xff]  ;;  %1677 = vpow2.f32 %v1602_v17  ;;  %v3068_v47 = vld [vmem:[%s3326_s10 + $0x1a8] sm:$0xff] }
 0x2e3   :  { %1171 = vmatpush.msrb.mxu2 %v3029_v10 }
 0x2e4   :  { %1208 = vmatpush.msrb.mxu3 %v2592_v40  ;;  %1194 = vmatpush.msrb.mxu1 %v2315_v51 }
 0x2e5   :  { %1172 = vmatpush.msrb.mxu2 %v3037_v53 }
 0x2e6   :  { %1209 = vmatpush.msrb.mxu3 %v2598_v3  ;;  %1195 = vmatpush.msrb.mxu1 %v2321_v52  ;;  %v1676_v52 = vpop.eup %1675 }
 0x2e7   :  { %1173 = vmatpush.msrb.mxu2 %v3048_v44  ;;  %vm974_vm4 = vweird.f32 %v1676_v52 }
 0x2e8   :  { %1210 = vmatpush.msrb.mxu3 %v2604_v49  ;;  %1196 = vmatpush.msrb.mxu1 %v2327_v55  ;;  %v3085_v49 = vld [vmem:[%s3326_s10 + $0x198] sm:$0xff]  ;;  %v3093_v55 = vld [vmem:[%s3326_s10 + $0x190] sm:$0xff]  ;;  %vm3130_vm5 = vmor %vm973_vm3, %vm974_vm4 }
 0x2e9   :  { %1174 = vmatpush.msrb.mxu2 %v3056_v22 }
 0x2ea   :  { %1211 = vmatpush.msrb.mxu3 %v2610_v26  ;;  %v1678_v26 = vpop.eup %1677  ;;  %1197 = vmatpush.msrb.mxu1 %v2333_v56 }
 0x2eb   :  { %1175 = vmatpush.msrb.mxu2 %v3068_v47  ;;  %v3104_v56 = vadd.f32 1.0, %v1678_v26 }
 0x2ec   :  { %1212 = vmatpush.msrb.mxu3 %v2618_v33  ;;  %v969_v33 = vmul.f32 %v1676_v52, %v3039_v21  ;;  %1198 = vmatpush.msrb.mxu1 %v2339_v57  ;;  %v3113_v57 = vld [vmem:[%s3326_s10 + $0x180] sm:$0xff] }
 0x2ed   :  { %1176 = vmatpush.msrb.mxu2 %v3077_v39  ;;  %vm1012_vm11 = vweird.f32 %v3104_v56 }
 0x2ee   :  { %1213 = vmatpush.msrb.mxu3 %v2624_v27  ;;  %v726_v27 = vperm.slane %v2808_v20, 2  ;;  %1199 = vmatpush.msrb.mxu1 %v2345_v61  ;;  %v970_v37 = vsub.f32 1.0, %v969_v33  ;;  %v937_v20 = vpop.f32.mrf.mxu1 }
 0x2ef   :  { %1177 = vmatpush.msrb.mxu2 %v3085_v49 }
 0x2f0   :  { %1214 = vmatpush.msrb.mxu3 %v2630_v34  ;;  %1200 = vmatpush.msrb.mxu1 %v2357_v60  ;;  %v3120_v61 = vadd.f32 %v2803_v5, %v726_v27 }
 0x2f1   :  { %v917_v40 = vpop.f32.mrf.mxu2  ;;  %1178 = vmatpush.msrb.mxu2 %v3093_v55 }
 0x2f2   :  { %v961_v3 = vadd.f32 %v917_v40, %v3060_v46  ;;  %1215 = vmatpush.msrb.mxu3 %v2636_v28  ;;  %3456 = vst [vmem:[#allocation66_spill] sm:$0xff] %v3120_v61  ;;  %1201 = vmatpush.msrb.mxu1 %v2369_v59  ;;  %v971_v28 = vmul.f32 %v1676_v52, %v970_v37  ;;  %v979_v40 = vand.u32 2147483648, %v3039_v21 }
 0x2f3   :  { %1179 = vmatpush.msrb.mxu2 %v3102_v11  ;;  %v962_v17 = vadd.f32 %v937_v20, %v3120_v61 }
 0x2f4   :  { %v1601_v51 = vmul.f32 -1.442695, %v961_v3  ;;  %1216 = vmatpush.msrb.mxu3 %v2642_v18  ;;  %v972_v5 = vadd.f32 %v1676_v52, %v971_v28  ;;  %v980_v26 = vor.u32 1.1754944e-38, %v979_v40 }
 0x2f5   :  { %1180 = vmatpush.msrb.mxu2 %v3113_v57 }
 0x2f6   :  { %1679 = vpow2.f32 %v1601_v51  ;;  %1217 = vmatpush.msrb.mxu3 %v2648_v19  ;;  %v977_v19 = vand.u32 2147483647, %v3039_v21  ;;  %v976_v51 = vsel %vm3130_vm5, %v1676_v52, %v972_v5  ;;  %v1018_v5 = vand.u32 2147483648, %v3104_v56 }
 0x2f7   :  { %1681 = vrcp.f32 %v3104_v56 }
 0x2f8   :  { %1218 = vmatpush.msrb.mxu3 %v2654_v29  ;;  %vm978_vm6 = vcmp.eq.f32.partialorder %v977_v19, 8.507059e+37  ;;  %v1019_v19 = vor.u32 1.1754944e-38, %v1018_v5  ;;  %v3493_v5 = vld [vmem:[#allocation36_spill] sm:$0xff] }
 0x2f9   :  { %v981_v20 = vsel %vm978_vm6, %v980_v26, %v976_v51 }
 0x2fa   :  { %1219 = vmatpush.msrb.mxu3 %v2660_v31 }
 0x2fc   :  { %v1680_v34 = vpop.eup %1679  ;;  %1220 = vmatpush.msrb.mxu3 %v2666_v14 }
 0x2fd   :  { %v986_v43 = vadd.f32 1.0, %v1680_v34  ;;  %v1682_v60 = vpop.eup %1681 }
 0x2fe   :  { %v1008_v3 = vmul.f32 %v1682_v60, %v3104_v56  ;;  %1221 = vmatpush.msrb.mxu3 %v2672_v63  ;;  %vm1013_vm12 = vweird.f32 %v1682_v60 }
 0x2ff   :  { %1683 = vrcp.f32 %v986_v43  ;;  %v998_v33 = vand.u32 2147483648, %v986_v43  ;;  %v996_v27 = vand.u32 2147483647, %v986_v43  ;;  %vm992_vm8 = vweird.f32 %v986_v43  ;;  %vm1014_vm13 = vmor %vm1012_vm11, %vm1013_vm12 }
 0x300   :  { %1685 = vtanh.f32 %v962_v17  ;;  %v1009_v34 = vsub.f32 1.0, %v1008_v3  ;;  %vm1462_vm11 = vcmask 523264   ;;  %vm1444_vm12 = vcmask 1040384  }
 0x301   :  { %v999_v28 = vor.u32 1.1754944e-38, %v998_v33  ;;  %vm997_vm10 = vcmp.eq.f32.partialorder %v996_v27, 8.507059e+37  ;;  %v3483_v27 = vld [vmem:[#allocation21_spill] sm:$0xff] }
 0x305   :  { %v1684_v18 = vpop.eup %1683 }
 0x306   :  { %v988_v29 = vmul.f32 %v1684_v18, %v986_v43  ;;  %vm993_vm7 = vweird.f32 %v1684_v18  ;;  %v1686_v21 = vpop.eup %1685  ;;  %v1016_v43 = vand.u32 2147483647, %v3104_v56 }
 0x307   :  { %vm994_vm9 = vmor %vm992_vm8, %vm993_vm7  ;;  %v1023_v61 = vmul.f32 %v1686_v21, %v981_v20  ;;  %v3486_v21 = vld [vmem:[#allocation23_spill] sm:$0xff]  ;;  %v3487_v20 = vld [vmem:[#allocation56_spill] sm:$0xff] }
 0x308   :  { %v989_v31 = vsub.f32 1.0, %v988_v29  ;;  %v1010_v29 = vmul.f32 %v1682_v60, %v1009_v34  ;;  %vm1017_vm14 = vcmp.eq.f32.partialorder %v1016_v43, 8.507059e+37  ;;  %v3484_v34 = vld [vmem:[#allocation22_spill] sm:$0xff]  ;;  %v3496_v43 = vld [vmem:[#allocation40_spill] sm:$0xff] }
 0x30a   :  { %v990_v14 = vmul.f32 %v1684_v18, %v989_v31  ;;  %v1011_v40 = vadd.f32 %v1682_v60, %v1010_v29  ;;  %v3491_v29 = vld [vmem:[#allocation33_spill] sm:$0xff] }
 0x30c   :  { %v991_v37 = vadd.f32 %v1684_v18, %v990_v14  ;;  %v3482_v14 = vld [vmem:[#allocation51_spill] sm:$0xff] }
 0x30e   :  { %v995_v17 = vsel %vm994_vm9, %v1684_v18, %v991_v37  ;;  %v1015_v18 = vsel %vm1014_vm13, %v1682_v60, %v1011_v40  ;;  %v3481_v60 = vld [vmem:[#allocation20_spill] sm:$0xff]  ;;  %v3485_v37 = vld [vmem:[#allocation27_spill] sm:$0xff] }
 0x30f   :  { %v1000_v63 = vsel %vm997_vm10, %v999_v28, %v995_v17  ;;  %v1020_v31 = vsel %vm1017_vm14, %v1019_v19, %v1015_v18  ;;  %v3488_v28 = vld [vmem:[#allocation30_spill] sm:$0xff]  ;;  %v3489_v17 = vld [vmem:[#allocation24_spill] sm:$0xff]  ;;  %v3495_v40 = vld [vmem:[#allocation63_spill] sm:$0xff] }
 0x310   :  { %v1022_v59 = vmul.f32 0.0, %v1000_v63  ;;  %v3490_v63 = vld [vmem:[#allocation59_spill] sm:$0xff]  ;;  %v3497_v19 = vld [vmem:[#allocation29_spill] sm:$0xff] }
 0x311   :  { %v3498_v18 = vld [vmem:[#allocation43_spill] sm:$0xff] }
 0x312   :  { %v3140_v52 = vadd.f32 %v1023_v61, %v1022_v59  ;;  %v3480_v61 = vld [vmem:[#allocation13_spill] sm:$0xff] }
 0x313   :  { %v3492_v59 = vld [vmem:[#allocation25_spill] sm:$0xff] }
 0x314   :  { %1687 = vtanh.f32 %v3140_v52 }
 0x31a   :  { %v1688_v3 = vpop.eup %1687 }
 0x31b   :  { %v1026_v51 = vmul.f32 %v1688_v3, %v1020_v31  ;;  %v3499_v3 = vld [vmem:[#allocation32_spill] sm:$0xff]  ;;  %v3500_v31 = vld [vmem:[#allocation46_spill] sm:$0xff] }
 0x31d   :  { %1060 = vmatmul.f32.vlgmr.msra.gmra.mxu2 %v1026_v51  ;;  %v1083_v26 = vrot.slane %v1026_v51, 1  ;;  %v1123_v33 = vrot.slane %v1026_v51, 2  ;;  %v1163_v56 = vrot.slane %v1026_v51, 3 }
 0x31e   :  { %1226 = vmatpush.msra.mxu2 %v2351_v42  ;;  %v3459_v42 = vld [vmem:[#allocation5_spill] sm:$0xff] }
 0x31f   :  { %1101 = vmatmul.f32.vlgmr.msra.gmra.mxu1 %v1083_v26  ;;  %1141 = vmatmul.f32.vlgmr.msra.gmra.mxu3 %v1123_v33  ;;  %v3503_v26 = vld [vmem:[#allocation39_spill] sm:$0xff]  ;;  %v3504_v33 = vld [vmem:[#allocation53_spill] sm:$0xff] }
 0x320   :  { %1227 = vmatpush.msra.mxu2 %v2363_v62  ;;  %1246 = vmatpush.msra.mxu1 %v2412_v50  ;;  %v3460_v62 = vld [vmem:[#allocation12_spill] sm:$0xff]  ;;  %v3466_v50 = vld [vmem:[#allocation15_spill] sm:$0xff] }
 0x321   :  { %1351 = vmatpush.msra.mxu3 %v2680_v23  ;;  %v3478_v23 = vld [vmem:[#allocation19_spill] sm:$0xff] }
 0x322   :  { %1228 = vmatpush.msra.mxu2 %v2376_v24  ;;  %1247 = vmatpush.msra.mxu1 %v2424_v54  ;;  %v3461_v24 = vld [vmem:[#allocation28_spill] sm:$0xff] }
 0x323   :  { %1352 = vmatpush.msra.mxu3 %v2686_v12  ;;  %v3468_v54 = vld [vmem:[#allocation8_spill] sm:$0xff]  ;;  %v3475_v12 = vld [vmem:[#allocation18_spill] sm:$0xff] }
 0x324   :  { %1229 = vmatpush.msra.mxu2 %v2382_v0  ;;  %1248 = vmatpush.msra.mxu1 %v2436_v6  ;;  %v3462_v0 = vld [vmem:[#allocation6_spill] sm:$0xff]  ;;  %v3469_v6 = vld [vmem:[#allocation16_spill] sm:$0xff] }
 0x325   :  { %1181 = vmatmul.f32.vlgmr.msrb.gmra.mxu2 %v1163_v56  ;;  %1353 = vmatpush.msra.mxu3 %v2696_v25  ;;  %v3479_v25 = vld [vmem:[#allocation47_spill] sm:$0xff] }
 0x326   :  { %1230 = vmatpush.msra.mxu2 %v2388_v58  ;;  %1249 = vmatpush.msra.mxu1 %v2448_v7  ;;  %v3463_v58 = vld [vmem:[#allocation14_spill] sm:$0xff]  ;;  %v3506_v56 = vld [vmem:[#allocation55_spill] sm:$0xff] }
 0x327   :  { %1202 = vmatmul.f32.vlgmr.msrb.gmra.mxu1 %v1026_v51  ;;  %1222 = vmatmul.f32.vlgmr.msrb.gmra.mxu3 %v1026_v51  ;;  %v3470_v7 = vld [vmem:[#allocation38_spill] sm:$0xff] }
 0x328   :  { %1231 = vmatpush.msra.mxu2 %v2394_v2  ;;  %1250 = vmatpush.msra.mxu1 %v2466_v8  ;;  %v3464_v2 = vld [vmem:[#allocation31_spill] sm:$0xff]  ;;  %v3471_v8 = vld [vmem:[#allocation9_spill] sm:$0xff] }
 0x329   :  { %1354 = vmatpush.msra.mxu3 %v2708_v1  ;;  %v3476_v1 = vld [vmem:[#allocation44_spill] sm:$0xff] }
 0x32a   :  { %1232 = vmatpush.msra.mxu2 %v2400_v48  ;;  %1251 = vmatpush.msra.mxu1 %v2481_v15  ;;  %v3465_v48 = vld [vmem:[#allocation7_spill] sm:$0xff]  ;;  %v3472_v15 = vld [vmem:[#allocation17_spill] sm:$0xff] }
 0x32b   :  { %1355 = vmatpush.msra.mxu3 %v2720_v30  ;;  %v3477_v30 = vld [vmem:[#allocation11_spill] sm:$0xff] }
 0x32c   :  { %1233 = vmatpush.msra.mxu2 %v2406_v4  ;;  %1252 = vmatpush.msra.mxu1 %v2496_v13  ;;  %v3467_v4 = vld [vmem:[#allocation34_spill] sm:$0xff]  ;;  %v3473_v13 = vld [vmem:[#allocation41_spill] sm:$0xff] }
 0x32d   :  { %1356 = vmatpush.msra.mxu3 %v2734_v35  ;;  %v3474_v35 = vld [vmem:[#allocation10_spill] sm:$0xff] }
 0x32e   :  { %1234 = vmatpush.msra.mxu2 %v3459_v42  ;;  %1253 = vmatpush.msra.mxu1 %v3460_v62  ;;  %v3508_v42 = vld [vmem:[#allocation58_spill] sm:$0xff]  ;;  %v3510_v62 = vld [vmem:[#allocation61_spill] sm:$0xff] }
 0x32f   :  { %1357 = vmatpush.msra.mxu3 %v3461_v24  ;;  %v3512_v24 = vld [vmem:[#allocation62_spill] sm:$0xff] }
 0x330   :  { %1235 = vmatpush.msra.mxu2 %v3462_v0  ;;  %1254 = vmatpush.msra.mxu1 %v3463_v58  ;;  %v3514_v0 = vld [vmem:[#allocation64_spill] sm:$0xff]  ;;  %v3517_v58 = vld [vmem:[#allocation65_spill] sm:$0xff] }
 0x331   :  { %1358 = vmatpush.msra.mxu3 %v3464_v2 }
 0x332   :  { %1236 = vmatpush.msra.mxu2 %v3465_v48  ;;  %1255 = vmatpush.msra.mxu1 %v3466_v50 }
 0x333   :  { %1359 = vmatpush.msra.mxu3 %v3467_v4 }
 0x334   :  { %1237 = vmatpush.msra.mxu2 %v3468_v54  ;;  %1256 = vmatpush.msra.mxu1 %v3469_v6  ;;  %v3518_v54 = vld [vmem:[#allocation50_spill] sm:$0xff] }
 0x335   :  { %1360 = vmatpush.msra.mxu3 %v3470_v7 }
 0x336   :  { %1238 = vmatpush.msra.mxu2 %v3471_v8  ;;  %1257 = vmatpush.msra.mxu1 %v3472_v15 }
 0x337   :  { %1361 = vmatpush.msra.mxu3 %v3473_v13 }
 0x338   :  { %1239 = vmatpush.msra.mxu2 %v3474_v35  ;;  %1258 = vmatpush.msra.mxu1 %v3475_v12 }
 0x339   :  { %1362 = vmatpush.msra.mxu3 %v3476_v1 }
 0x33a   :  { %1240 = vmatpush.msra.mxu2 %v3477_v30  ;;  %1259 = vmatpush.msra.mxu1 %v3478_v23 }
 0x33b   :  { %1363 = vmatpush.msra.mxu3 %v3479_v25  ;;  %v1453_v25 = vld [vmem:[%s3328_s12 + $0x38] sm:$0xff] }
 0x33c   :  { %1241 = vmatpush.msra.mxu2 %v3480_v61  ;;  %1260 = vmatpush.msra.mxu1 %v3481_v60  ;;  %v1452_v61 = vld [vmem:[%s3328_s12 + $0x30] sm:$0xff] }
 0x33d   :  { %1242 = vmatmul.f32.vlgmr.msra.gmra.mxu2 %v1026_v51  ;;  %1364 = vmatpush.msra.mxu3 %v3482_v14 }
 0x33e   :  { %1261 = vmatpush.msra.mxu1 %v3483_v27  ;;  %1374 = vmatpush.msrb.mxu2 %v3484_v34 }
 0x33f   :  { %1262 = vmatmul.f32.vlgmr.msra.gmra.mxu1 %v1026_v51  ;;  %1365 = vmatpush.msra.mxu3 %v2910_v9  ;;  %v3494_v9 = vld [vmem:[#allocation26_spill] sm:$0xff]  ;;  %v3502_v51 = vld [vmem:[#allocation49_spill] sm:$0xff] }
 0x340   :  { %1397 = vmatpush.msrb.mxu1 %v3485_v37  ;;  %1375 = vmatpush.msrb.mxu2 %v3486_v21  ;;  %v1450_v37 = vld [vmem:[%s3328_s12 + $0x20] sm:$0xff] }
 0x341   :  { %1366 = vmatpush.msra.mxu3 %v3487_v20 }
 0x342   :  { %1398 = vmatpush.msrb.mxu1 %v3488_v28  ;;  %1376 = vmatpush.msrb.mxu2 %v3489_v17 }
 0x343   :  { %1420 = vmatpush.msrb.mxu3 %v3490_v63 }
 0x344   :  { %1399 = vmatpush.msrb.mxu1 %v3491_v29  ;;  %1377 = vmatpush.msrb.mxu2 %v3492_v59 }
 0x345   :  { %1421 = vmatpush.msrb.mxu3 %v2964_v45  ;;  %v3501_v45 = vld [vmem:[#allocation35_spill] sm:$0xff] }
 0x346   :  { %1400 = vmatpush.msrb.mxu1 %v3493_v5  ;;  %1378 = vmatpush.msrb.mxu2 %v3494_v9  ;;  %v1449_v9 = vld [vmem:[%s3328_s12 + $0x18] sm:$0xff] }
 0x347   :  { %1422 = vmatpush.msrb.mxu3 %v3495_v40  ;;  %v1448_v40 = vld [vmem:[%s3328_s12 + $0x10] sm:$0xff] }
 0x348   :  { %1401 = vmatpush.msrb.mxu1 %v3496_v43  ;;  %1379 = vmatpush.msrb.mxu2 %v3497_v19  ;;  %v3519_v19 = vld [vmem:[#allocation66_spill] sm:$0xff] }
 0x349   :  { %1423 = vmatpush.msrb.mxu3 %v2991_v36  ;;  %v3505_v36 = vld [vmem:[#allocation42_spill] sm:$0xff] }
 0x34a   :  { %1402 = vmatpush.msrb.mxu1 %v3498_v18  ;;  %1380 = vmatpush.msrb.mxu2 %v3499_v3 }
 0x34b   :  { %1424 = vmatpush.msrb.mxu3 %v3006_v38  ;;  %v3507_v38 = vld [vmem:[#allocation45_spill] sm:$0xff] }
 0x34c   :  { %1403 = vmatpush.msrb.mxu1 %v3500_v31  ;;  %1381 = vmatpush.msrb.mxu2 %v3501_v45 }
 0x34d   :  { %1425 = vmatpush.msrb.mxu3 %v3019_v41  ;;  %v3509_v41 = vld [vmem:[#allocation48_spill] sm:$0xff] }
 0x34e   :  { %1404 = vmatpush.msrb.mxu1 %v3502_v51  ;;  %1382 = vmatpush.msrb.mxu2 %v3503_v26  ;;  %v1446_v26 = vld [vmem:[%s3328_s12] sm:$0xff] }
 0x34f   :  { %1426 = vmatpush.msrb.mxu3 %v3029_v10  ;;  %v3511_v10 = vld [vmem:[#allocation52_spill] sm:$0xff] }
 0x350   :  { %1405 = vmatpush.msrb.mxu1 %v3504_v33  ;;  %1383 = vmatpush.msrb.mxu2 %v3505_v36 }
 0x351   :  { %1427 = vmatpush.msrb.mxu3 %v3037_v53  ;;  %v3513_v53 = vld [vmem:[#allocation54_spill] sm:$0xff] }
 0x352   :  { %1406 = vmatpush.msrb.mxu1 %v3506_v56  ;;  %1384 = vmatpush.msrb.mxu2 %v3507_v38 }
 0x353   :  { %1428 = vmatpush.msrb.mxu3 %v3048_v44  ;;  %v3515_v44 = vld [vmem:[#allocation57_spill] sm:$0xff] }
 0x354   :  { %1407 = vmatpush.msrb.mxu1 %v3508_v42  ;;  %1385 = vmatpush.msrb.mxu2 %v3509_v41 }
 0x355   :  { %1429 = vmatpush.msrb.mxu3 %v3056_v22  ;;  %v3516_v22 = vld [vmem:[#allocation60_spill] sm:$0xff] }
 0x356   :  { %1408 = vmatpush.msrb.mxu1 %v3510_v62  ;;  %1386 = vmatpush.msrb.mxu2 %v3511_v10 }
 0x357   :  { %1430 = vmatpush.msrb.mxu3 %v3068_v47 }
 0x358   :  { %1409 = vmatpush.msrb.mxu1 %v3512_v24  ;;  %1387 = vmatpush.msrb.mxu2 %v3513_v53 }
 0x359   :  { %1431 = vmatpush.msrb.mxu3 %v3077_v39  ;;  %v3244_v39 = vld [vmem:[%s3327_s11] sm:$0x1] }
 0x35a   :  { %1410 = vmatpush.msrb.mxu1 %v3514_v0  ;;  %1388 = vmatpush.msrb.mxu2 %v3515_v44  ;;  %v1341_v44 = vrot.slane %v3140_v52, 4 }
 0x35b   :  { %1432 = vmatpush.msrb.mxu3 %v3085_v49 }
 0x35c   :  { %1411 = vmatpush.msrb.mxu1 %v2998_v16  ;;  %1389 = vmatpush.msrb.mxu2 %v3516_v22 }
 0x35d   :  { %1433 = vmatpush.msrb.mxu3 %v3093_v55 }
 0x35e   :  { %1412 = vmatpush.msrb.mxu1 %v3517_v58 }
 0x35f   :  { %1434 = vmatpush.msrb.mxu3 %v3102_v11 }
 0x360   :  { %1497 = vmatpush.msra.mxu1 %v1453_v25  ;;  %v1461_v25 = vld [vmem:[%s3329_s13 + $0x38] sm:$0xff] }
 0x361   :  { %1435 = vmatpush.msrb.mxu3 %v3113_v57  ;;  %1474 = vmatpush.msra.mxu2 %v1461_v25 }
 0x362   :  { %1498 = vmatpush.msra.mxu1 %v1452_v61  ;;  %v1460_v61 = vld [vmem:[%s3329_s13 + $0x30] sm:$0xff] }
 0x363   :  { %1475 = vmatpush.msra.mxu2 %v1460_v61 }
 0x39c   :  { %v1102_v47 = vpop.f32.mrf.mxu1 }
 0x3a0   :  { %v1061_v2 = vpop.f32.mrf.mxu2 }
 0x3a1   :  { %v1064_v49 = vadd.f32 %v1061_v2, %v3244_v39 }
 0x3a2   :  { %v1142_v16 = vpop.f32.mrf.mxu3 }
 0x3a3   :  { %v1105_v48 = vadd.f32 %v1102_v47, %v1064_v49 }
 0x3a4   :  { %v1203_v50 = vpop.f32.mrf.mxu1 }
 0x3a5   :  { %v1145_v4 = vadd.f32 %v1142_v16, %v1105_v48  ;;  %v1270_v55 = vrot.slane %v1203_v50, 4 }
 0x3a7   :  { %v1278_v6 = vadd.f32 %v1270_v55, %v3518_v54 }
 0x3a8   :  { %v1182_v7 = vpop.f32.mrf.mxu2 }
 0x3a9   :  { %v1651_v11 = vmul.f32 -1.442695, %v1278_v6  ;;  %v3248_v8 = vadd.f32 %v1182_v7, %v1145_v4 }
 0x3aa   :  { %v1223_v57 = vpop.f32.mrf.mxu3 }
 0x3ab   :  { %1689 = vpow2.f32 %v1651_v11  ;;  %v1271_v15 = vrot.slane %v1223_v57, 4 }
 0x3ad   :  { %v1279_v13 = vadd.f32 %v1271_v15, %v3060_v46  ;;  %v1451_v46 = vld [vmem:[%s3328_s12 + $0x28] sm:$0xff] }
 0x3ae   :  { %1499 = vmatpush.msra.mxu1 %v1451_v46  ;;  %v1457_v46 = vld [vmem:[%s3329_s13 + $0x18] sm:$0xff] }
 0x3af   :  { %v1652_v35 = vmul.f32 -1.442695, %v1279_v13 }
 0x3b0   :  { %1500 = vmatpush.msra.mxu1 %v1450_v37  ;;  %v1454_v37 = vld [vmem:[%s3329_s13] sm:$0xff] }
 0x3b1   :  { %v1690_v12 = vpop.eup %1689  ;;  %1691 = vpow2.f32 %v1652_v35 }
 0x3b2   :  { %v1285_v1 = vadd.f32 1.0, %v1690_v12  ;;  %1501 = vmatpush.msra.mxu1 %v1449_v9  ;;  %v1671_v12 = vld [vmem:[%s3321_s5] ss:$0 sm:$0xff] }
 0x3b4   :  { %1693 = vrcp.f32 %v1285_v1  ;;  %1502 = vmatpush.msra.mxu1 %v1448_v40  ;;  %v1297_v33 = vand.u32 2147483648, %v1285_v1  ;;  %vm1291_vm3 = vweird.f32 %v1285_v1  ;;  %v1295_v56 = vand.u32 2147483647, %v1285_v1 }
 0x3b6   :  { %v1298_v53 = vor.u32 1.1754944e-38, %v1297_v33  ;;  %vm1296_vm6 = vcmp.eq.f32.partialorder %v1295_v56, 8.507059e+37 }
 0x3b7   :  { %v1692_v30 = vpop.eup %1691 }
 0x3b8   :  { %v1304_v23 = vadd.f32 1.0, %v1692_v30  ;;  %v3520_v30 = vld [vmem:[#allocation37_spill] sm:$0xff] }
 0x3ba   :  { %v1694_v60 = vpop.eup %1693  ;;  %1695 = vrcp.f32 %v1304_v23  ;;  %v1316_v31 = vand.u32 2147483648, %v1304_v23  ;;  %v1314_v51 = vand.u32 2147483647, %v1304_v23  ;;  %vm1310_vm1 = vweird.f32 %v1304_v23 }
 0x3bb   :  { %v1287_v14 = vmul.f32 %v1694_v60, %v1285_v1  ;;  %vm1292_vm0 = vweird.f32 %v1694_v60 }
 0x3bc   :  { %v1263_v27 = vpop.f32.mrf.mxu1  ;;  %v1317_v42 = vor.u32 1.1754944e-38, %v1316_v31  ;;  %vm1293_vm4 = vmor %vm1291_vm3, %vm1292_vm0  ;;  %vm1315_vm5 = vcmp.eq.f32.partialorder %v1314_v51, 8.507059e+37 }
 0x3bd   :  { %v1273_v34 = vrot.slane %v1263_v27, 4  ;;  %v1288_v21 = vsub.f32 1.0, %v1287_v14  ;;  %v1458_v14 = vld [vmem:[%s3329_s13 + $0x20] sm:$0xff]  ;;  %v1456_v27 = vld [vmem:[%s3329_s13 + $0x10] sm:$0xff] }
 0x3bf   :  { %v1281_v20 = vadd.f32 %v1273_v34, %v3000_v32  ;;  %v1289_v5 = vmul.f32 %v1694_v60, %v1288_v21  ;;  %v1447_v32 = vld [vmem:[%s3328_s12 + $0x8] sm:$0xff] }
 0x3c0   :  { %v1696_v28 = vpop.eup %1695  ;;  %v1243_v17 = vpop.f32.mrf.mxu2  ;;  %1503 = vmatpush.msra.mxu1 %v1447_v32  ;;  %v1455_v34 = vld [vmem:[%s3329_s13 + $0x8] sm:$0xff] }
 0x3c1   :  { %v1306_v63 = vmul.f32 %v1696_v28, %v1304_v23  ;;  %v1653_v29 = vmul.f32 -1.442695, %v1281_v20  ;;  %v1272_v59 = vrot.slane %v1243_v17, 4  ;;  %vm1311_vm15 = vweird.f32 %v1696_v28 }
 0x3c2   :  { %v1290_v45 = vadd.f32 %v1694_v60, %v1289_v5  ;;  %vm1312_vm2 = vmor %vm1310_vm1, %vm1311_vm15  ;;  %1504 = vmatpush.msra.mxu1 %v1446_v26  ;;  %v707_v23 = vadd.f32 %v1671_v12, %v3520_v30 }
 0x3c3   :  { %v1307_v43 = vsub.f32 1.0, %v1306_v63  ;;  %1697 = vpow2.f32 %v1653_v29  ;;  %v1280_v18 = vadd.f32 %v1272_v59, %v3519_v19 }
 0x3c4   :  { %v1294_v10 = vsel %vm1293_vm4, %v1694_v60, %v1290_v45  ;;  %v1459_v60 = vld [vmem:[%s3329_s13 + $0x28] sm:$0xff]  ;;  %s1732_s13 = smov [#allocation2]  }
 0x3c5   :  { %v1308_v3 = vmul.f32 %v1696_v28, %v1307_v43  ;;  %1699 = vtanh.f32 %v1280_v18  ;;  %v1299_v22 = vsel %vm1296_vm6, %v1298_v53, %v1294_v10  ;;  %1476 = vmatpush.msra.mxu2 %v1459_v60  ;;  %v1672_v43 = vld [vmem:[%s3330_s14] ss:$0 sm:$0xff]  ;;  %s1520_s7 = sshll.u32 %s1732_s13, 4  ;;  %s1521_s7 = int_to_ptr.vmem [resolvable:$true] %s1520_s7 }
 0x3c7   :  { %v1309_v36 = vadd.f32 %v1696_v28, %v1308_v3  ;;  %1477 = vmatpush.msra.mxu2 %v1458_v14 }
 0x3c9   :  { %v1698_v38 = vpop.eup %1697  ;;  %v1313_v41 = vsel %vm1312_vm2, %v1696_v28, %v1309_v36  ;;  %1478 = vmatpush.msra.mxu2 %v1457_v46 }
 0x3ca   :  { %v1324_v62 = vadd.f32 1.0, %v1698_v38  ;;  %v1318_v0 = vsel %vm1315_vm5, %v1317_v42, %v1313_v41 }
 0x3cb   :  { %v1700_v24 = vpop.eup %1699  ;;  %v1343_v58 = vmul.f32 %v1341_v44, %v1318_v0  ;;  %1479 = vmatpush.msra.mxu2 %v1456_v27 }
 0x3cc   :  { %1701 = vrcp.f32 %v1324_v62  ;;  %v1344_v47 = vmul.f32 %v1700_v24, %v1299_v22  ;;  %v1336_v50 = vand.u32 2147483648, %v1324_v62  ;;  %v1334_v55 = vand.u32 2147483647, %v1324_v62 }
 0x3cd   :  { %vm1330_vm8 = vweird.f32 %v1324_v62  ;;  %1480 = vmatpush.msra.mxu2 %v1455_v34 }
 0x3ce   :  { %v1345_v49 = vadd.f32 %v1344_v47, %v1343_v58  ;;  %v1337_v6 = vor.u32 1.1754944e-38, %v1336_v50  ;;  %vm1335_vm10 = vcmp.eq.f32.partialorder %v1334_v55, 8.507059e+37 }
 0x3cf   :  { %1481 = vmatpush.msra.mxu2 %v1454_v37 }
 0x3d0   :  { %1703 = vtanh.f32 %v1345_v49 }
 0x3d2   :  { %v1702_v2 = vpop.eup %1701 }
 0x3d3   :  { %v1326_v16 = vmul.f32 %v1702_v2, %v1324_v62  ;;  %vm1331_vm7 = vweird.f32 %v1702_v2 }
 0x3d4   :  { %vm1332_vm9 = vmor %vm1330_vm8, %vm1331_vm7 }
 0x3d5   :  { %v1327_v48 = vsub.f32 1.0, %v1326_v16 }
 0x3d6   :  { %v1704_v11 = vpop.eup %1703 }
 0x3d7   :  { %v1328_v4 = vmul.f32 %v1702_v2, %v1327_v48 }
 0x3d9   :  { %v1329_v54 = vadd.f32 %v1702_v2, %v1328_v4 }
 0x3db   :  { %v1333_v7 = vsel %vm1332_vm9, %v1702_v2, %v1329_v54 }
 0x3dc   :  { %v1338_v52 = vsel %vm1335_vm10, %v1337_v6, %v1333_v7 }
 0x3dd   :  { %v1347_v57 = vmul.f32 %v1704_v11, %v1338_v52 }
 0x3df   :  { %v1349_v15 = vrot.slane %v1347_v57, 4  ;;  %v1372_v13 = vrot.slane %v1347_v57, 5  ;;  %v1395_v35 = vrot.slane %v1347_v57, 6  ;;  %v1418_v1 = vrot.slane %v1347_v57, 7 }
 0x3e1   :  { %1367 = vmatmul.f32.vlgmr.msra.gmra.mxu3 %v1349_v15  ;;  %1390 = vmatmul.f32.vlgmr.msrb.gmra.mxu2 %v1372_v13 }
 0x3e2   :  { %1413 = vmatmul.f32.vlgmr.msrb.gmra.mxu1 %v1395_v35 }
 0x3e9   :  { %1436 = vmatmul.f32.vlgmr.msrb.gmra.mxu3 %v1418_v1 }
 0x3ea   :  { %1655 = vmatmul.msk.f32.vlgmr.msra.gmra.mxu1 %vm1462_vm11, %v707_v23 }
 0x45f   :  { %v1414_v63 = vpop.f32.mrf.mxu1 }
 0x464   :  { %v1368_v21 = vpop.f32.mrf.mxu3  ;;  %v1391_v28 = vpop.f32.mrf.mxu2 }
 0x465   :  { %v1371_v20 = vadd.f32 %v1368_v21, %v3244_v39 }
 0x467   :  { %v1394_v17 = vadd.f32 %v1391_v28, %v1371_v20  ;;  %v1506_v19 = vpop.f32.mrf.mxu1 }
 0x469   :  { %v1417_v29 = vadd.f32 %v1414_v63, %v1394_v17 }
 0x46c   :  { %v1437_v59 = vpop.f32.mrf.mxu3 }
 0x46d   :  { %v1440_v5 = vadd.f32 %v1437_v59, %v1417_v29 }
 0x46f   :  { %v1442_v9 = vperm.slane %v1440_v5, 0 }
 0x471   :  { %v1445_v40 = vsel %vm1444_vm12, %v3248_v8, %v1442_v9 }
 0x472   :  { %1654 = vmatmul.msk.f32.vlgmr.msra.gmra.mxu2 %vm1462_vm11, %v1445_v40 }
 0x4f5   :  { %v1483_v18 = vpop.f32.mrf.mxu2 }
 0x4f6   :  { %v1507_v39 = vadd.f32 %v1506_v19, %v1483_v18 }
 0x4f8   :  { %v1513_v32 = vadd.f32 %v1672_v43, %v1507_v39 }
 0x4fa   :  { %1514 = vst [vmem:[#allocation2] sm:$0x3] %v1513_v32 }
 0x4fb   :  { %1525 = dma.vmem_to_hbm [thread:$0]  %s1521_s7, 32, %s1523_s19, [#allocation3]  }
 0x4fc   :  { %1729 = dma.done.wait [#allocation3], 32  }
 0x4fd   :  { %1730 = vsyncadd [#allocation3], 4294967264 }
 0x4fe   :  { %1530 = vsyncpa [#allocation3], 1 }

</bundles_post_ra>
